<compile_context>
chip_gen: v5e
topology: v5e:2x2
jax: 0.10.0
libtpu: 0.0.40
codegen_flags: <defaults>
</compile_context>

<pallas_src>
import functools

import jax
import jax.numpy as jnp
from jax.experimental import pallas as pl
from jax.experimental.pallas import tpu as pltpu

SEQ_LEN = 20           # implied by pool kernel sizes 19/18/17 with conv heights 2/3/4
UNITS = 100            # implied by l1.in_features == 600 == 6 * units
HIDDEN = 100
NUM_CLASSES = 4
CONV_KS = (2, 3, 4)

CONV_CH = 2 * UNITS    # fused (conv1k | conv2k) channels = 200
CONV_CH_PAD = 256      # pad to full MXU / lane width
HIDDEN_PAD = 128       # pad hidden 100 -> 128

MAX_TB = 512           # batch-tile size cap; tiny VMEM footprint with this structure


def _round_up(x, m):
    return ((x + m - 1) // m) * m


def _choose_tiling(batch):
    """Fewest tiles of size <= MAX_TB; >=2 tiles when possible (v7x megacore)."""
    b8 = _round_up(max(batch, 1), 8)
    n_tiles = -(-b8 // MAX_TB)
    if n_tiles < 2 and b8 >= 16:
        n_tiles = 2
    tb = _round_up(-(-b8 // n_tiles), 8)
    return tb, tb * n_tiles


def _const_spec(a):
    nd = a.ndim
    return pl.BlockSpec(a.shape, lambda b, _n=nd: (0,) * _n)


# ----------------------------------------------------------------------------
# Pallas kernel (one batch tile of TB samples per grid step)
# ----------------------------------------------------------------------------
def _textcnn_kernel(x_ref, wk2_ref, wk3_ref, wk4_ref, bconv_ref,
                    wl1_ref, bl1_ref, wl2_ref, bl2_ref, out_ref, *, d):
    # x_ref    : (TB, SEQ_LEN*D) bf16  (raw embeddings, time flattened into lanes)
    # wk{k}_ref: (k*D, 256) bf16       (conv1k | conv2k fused along units, zero-padded)
    # bconv_ref: (3, 1, 256) f32
    # wl1_ref  : (3, 256, 128) bf16    (l1 weight reordered per conv height, padded)
    # bl1_ref  : (1, 128) f32 ; wl2_ref: (128, 4) bf16 ; bl2_ref: (1, 4) f32
    # out_ref  : (TB, 4) f32

    def conv_relu_maxpool(wk_ref, bidx, k):
        l_out = SEQ_LEN - k + 1
        kd = k * d

        def z_at(t):
            win = x_ref[:, t * d:t * d + kd]                     # (TB, k*D) static slice
            return jnp.dot(win, wk_ref[...],
                           preferred_element_type=jnp.float32)   # (TB, 256) f32

        m = z_at(0)
        for t in range(1, l_out):                                # running max over time
            m = jnp.maximum(m, z_at(t))
        # bias + ReLU AFTER the pool (exact re-association).
        return jnp.maximum(m + bconv_ref[bidx], 0.0)             # (TB, 256) f32

    p2 = conv_relu_maxpool(wk2_ref, 0, 2)                        # [p11 | p21]
    p3 = conv_relu_maxpool(wk3_ref, 1, 3)                        # [p12 | p22]
    p4 = conv_relu_maxpool(wk4_ref, 2, 4)                        # [p13 | p23]

    # Linear(600,100) without the lane-axis concat: sum of per-height matmuls.
    h = (jnp.dot(p2.astype(jnp.bfloat16), wl1_ref[0], preferred_element_type=jnp.float32)
         + jnp.dot(p3.astype(jnp.bfloat16), wl1_ref[1], preferred_element_type=jnp.float32)
         + jnp.dot(p4.astype(jnp.bfloat16), wl1_ref[2], preferred_element_type=jnp.float32))
    h = jnp.maximum(h + bl1_ref[...], 0.0)                       # (TB, 128)
    # TODO(synk): nn.Dropout is identity in eval mode; training-mode RNG masking not implemented.
    out_ref[...] = jnp.dot(h.astype(jnp.bfloat16), wl2_ref[...],
                           preferred_element_type=jnp.float32) + bl2_ref[...]


# ----------------------------------------------------------------------------
# Wrapper: batch padding, BlockSpecs, pallas_call
# ----------------------------------------------------------------------------
def textcnn_forward(emb, packed):
    """emb: (B, SEQ_LEN, D) float32 embedded tokens; packed: tuple from pack_params."""
    wk2, wk3, wk4, bconv, wl1r, bl1, wl2, bl2 = packed
    B, L, D = emb.shape
    assert L == SEQ_LEN

    tb, b_pad = _choose_tiling(B)
    x = emb.astype(jnp.bfloat16).reshape(B, L * D)               # (B, 320) lane-dense
    if b_pad != B:
        x = jnp.pad(x, ((0, b_pad - B), (0, 0)))

    in_specs = [pl.BlockSpec((tb, L * D), lambda b: (b, 0))] \
        + [_const_spec(p) for p in packed]
    out_specs = pl.BlockSpec((tb, NUM_CLASSES), lambda b: (b, 0))

    conv_flops = 2 * b_pad * sum((SEQ_LEN - k + 1) * (k * D) * CONV_CH_PAD for k in CONV_KS)
    fc_flops = 2 * b_pad * (3 * CONV_CH_PAD * HIDDEN_PAD + HIDDEN_PAD * NUM_CLASSES)
    bytes_accessed = (int(x.nbytes)
                      + sum(int(p.nbytes) for p in packed)
                      + b_pad * NUM_CLASSES * 4)

    out = pl.pallas_call(
        functools.partial(_textcnn_kernel, d=D),
        out_shape=jax.ShapeDtypeStruct((b_pad, NUM_CLASSES), jnp.float32),
        grid_spec=pltpu.PrefetchScalarGridSpec(
            num_scalar_prefetch=0,
            grid=(b_pad // tb,),
            in_specs=in_specs,
            out_specs=out_specs,
        ),
        compiler_params=pltpu.CompilerParams(
            dimension_semantics=("parallel",),
            vmem_limit_bytes=32 * 1024 * 1024,   # well under v7x's 64 MiB physical VMEM
        ),
        cost_estimate=pl.CostEstimate(flops=conv_flops + fc_flops,
                                      transcendentals=0,
                                      bytes_accessed=bytes_accessed),
    )(x, *packed)
    return out[:B]


# ----------------------------------------------------------------------------
# Parameter init (PyTorch layout) + packing into kernel layout
# ----------------------------------------------------------------------------
def init_torch_params(key, vocab_num, out_dim):
    ks = jax.random.split(key, 17)

    def conv(kw, kb, kh):
        w = jax.random.normal(kw, (UNITS, 1, kh, out_dim), jnp.float32) * 0.05
        b = jax.random.normal(kb, (UNITS,), jnp.float32) * 0.01
        return w, b

    w11, b11 = conv(ks[0], ks[1], 2)
    w12, b12 = conv(ks[2], ks[3], 3)
    w13, b13 = conv(ks[4], ks[5], 4)
    w21, b21 = conv(ks[6], ks[7], 2)
    w22, b22 = conv(ks[8], ks[9], 3)
    w23, b23 = conv(ks[10], ks[11], 4)

    wl1 = jax.random.normal(ks[12], (HIDDEN, 6 * UNITS), jnp.float32) * 0.05  # (out,in)
    bl1 = jax.random.normal(ks[13], (HIDDEN,), jnp.float32) * 0.01
    wl2 = jax.random.normal(ks[14], (NUM_CLASSES, HIDDEN), jnp.float32) * 0.05
    bl2 = jax.random.normal(ks[15], (NUM_CLASSES,), jnp.float32) * 0.01

    emb_table = jax.random.normal(ks[16], (vocab_num, out_dim), jnp.float32) * 0.05
    emb_table = emb_table.at[0].set(0.0)  # padding_idx=0

    return dict(w11=w11, b11=b11, w12=w12, b12=b12, w13=w13, b13=b13,
                w21=w21, b21=b21, w22=w22, b22=b22, w23=w23, b23=b23,
                wl1=wl1, bl1=bl1, wl2=wl2, bl2=bl2, emb=emb_table)


def pack_params(tp):
    D = tp["w11"].shape[-1]
    ch_pad = CONV_CH_PAD - CONV_CH
    hid_pad = HIDDEN_PAD - HIDDEN

    def fuse_conv(w1, w2, k):
        # torch (U,1,k,D) -> (k*D, U); fuse same-height branches along units; zero-pad to 256.
        a = jnp.transpose(w1.reshape(UNITS, k * D))
        b = jnp.transpose(w2.reshape(UNITS, k * D))
        w = jnp.concatenate([a, b], axis=1)                               # (k*D, 200)
        return jnp.pad(w, ((0, 0), (0, ch_pad))).astype(jnp.bfloat16)     # (k*D, 256)

    wk2 = fuse_conv(tp["w11"], tp["w21"], 2)
    wk3 = fuse_conv(tp["w12"], tp["w22"], 3)
    wk4 = fuse_conv(tp["w13"], tp["w23"], 4)

    def fuse_bias(b1, b2):
        b = jnp.concatenate([b1, b2])
        return jnp.pad(b, (0, ch_pad))[None, :]                           # (1, 256)

    bconv = jnp.stack([fuse_bias(tp["b11"], tp["b21"]),
                       fuse_bias(tp["b12"], tp["b22"]),
                       fuse_bias(tp["b13"], tp["b23"])], axis=0)          # (3, 1, 256) f32

    # torch l1 weight (100, 600) -> (600, 100); reorder into per-conv-height blocks
    # so that block k multiplies the fused pooled vector [p1k | p2k]; zero-pad to (256,128).
    wl1 = tp["wl1"].T

    def l1_block(i):
        blk = jnp.concatenate([wl1[i * UNITS:(i + 1) * UNITS],
                               wl1[(i + 3) * UNITS:(i + 4) * UNITS]], axis=0)  # (200, 100)
        return jnp.pad(blk, ((0, ch_pad), (0, hid_pad)))

    wl1r = jnp.stack([l1_block(0), l1_block(1), l1_block(2)],
                     axis=0).astype(jnp.bfloat16)                         # (3, 256, 128)

    bl1 = jnp.pad(tp["bl1"], (0, hid_pad))[None, :]                       # (1, 128) f32
    wl2 = jnp.pad(tp["wl2"].T, ((0, hid_pad), (0, 0))).astype(jnp.bfloat16)  # (128, 4)
    bl2 = tp["bl2"][None, :]                                              # (1, 4) f32
    return (wk2, wk3, wk4, bconv, wl1r, bl1, wl2, bl2)


# ----------------------------------------------------------------------------
# Pure-JAX f32 reference (mirrors the PyTorch forward) for correctness check
# ----------------------------------------------------------------------------
def textcnn_reference(emb, tp):
    def branch(w, b, k):
        l_out = SEQ_LEN - k + 1
        win = jnp.stack([emb[:, j:j + l_out, :] for j in range(k)], axis=2)  # (B,l_out,k,D)
        z = jnp.einsum("blkd,ukd->blu", win, w[:, 0]) + b
        return jnp.maximum(z, 0.0).max(axis=1)                                # (B, U)

    p11 = branch(tp["w11"], tp["b11"], 2)
    p12 = branch(tp["w12"], tp["b12"], 3)
    p13 = branch(tp["w13"], tp["b13"], 4)
    p21 = branch(tp["w21"], tp["b21"], 2)
    p22 = branch(tp["w22"], tp["b22"], 3)
    p23 = branch(tp["w23"], tp["b23"], 4)
    feat = jnp.concatenate([p11, p12, p13, p21, p22, p23], axis=-1)
    h = jnp.maximum(feat @ tp["wl1"].T + tp["bl1"], 0.0)
    return h @ tp["wl2"].T + tp["bl2"]


if __name__ == "__main__":
    key = jax.random.PRNGKey(0)
    vocab_num = 50
    out_dim = 16          # embedding dim D (free hyperparameter of the module)
    batch = 2

    tp = init_torch_params(key, vocab_num, out_dim)
    packed = pack_params(tp)

    # token ids (B, SEQ_LEN); 0 is the padding index
    x = jax.random.randint(jax.random.PRNGKey(1), (batch, SEQ_LEN), 0, vocab_num, jnp.int32)
    # embedding lookup (glue, plain JAX) -> (B, L, D) float32
    emb = jnp.take(tp["emb"], x, axis=0)

    fwd = jax.jit(textcnn_forward)
    logits = fwd(emb, packed)
    jax.block_until_ready(logits)
    assert logits.shape == (batch, NUM_CLASSES)

    ref = textcnn_reference(emb, tp)
    assert jnp.allclose(logits, ref, atol=2e-2, rtol=2e-2), (logits, ref)
    print("KERNEL_OK")
</pallas_src>

<mosaic_0001>
module attributes {stable_mosaic.version = 11 : i64} {
  func.func @_textcnn_kernel(%arg0: i32, %arg1: memref<8x320xbf16, #tpu.memory_space<vmem>>, %arg2: memref<32x256xbf16, #tpu.memory_space<vmem>>, %arg3: memref<48x256xbf16, #tpu.memory_space<vmem>>, %arg4: memref<64x256xbf16, #tpu.memory_space<vmem>>, %arg5: memref<3x1x256xf32, #tpu.memory_space<vmem>>, %arg6: memref<3x256x128xbf16, #tpu.memory_space<vmem>>, %arg7: memref<1x128xf32, #tpu.memory_space<vmem>>, %arg8: memref<128x4xbf16, #tpu.memory_space<vmem>>, %arg9: memref<1x4xf32, #tpu.memory_space<vmem>>, %arg10: memref<8x4xf32, #tpu.memory_space<vmem>>) attributes {dimension_semantics = [#tpu.dimension_semantics<parallel>], iteration_bounds = array<i64: 1>, scalar_prefetch = 0 : i64, scratch_operands = 0 : i64, tpu.core_type = #tpu.core_type<tc>, window_params = [{transform_indices = @transform_0, window_bounds = array<i64: 8, 320>}, {pipeline_mode = #tpu.pipeline_mode<synchronous>, transform_indices = @transform_1, window_bounds = array<i64: 32, 256>}, {pipeline_mode = #tpu.pipeline_mode<synchronous>, transform_indices = @transform_2, window_bounds = array<i64: 48, 256>}, {pipeline_mode = #tpu.pipeline_mode<synchronous>, transform_indices = @transform_3, window_bounds = array<i64: 64, 256>}, {pipeline_mode = #tpu.pipeline_mode<synchronous>, transform_indices = @transform_4, window_bounds = array<i64: 3, 1, 256>}, {pipeline_mode = #tpu.pipeline_mode<synchronous>, transform_indices = @transform_5, window_bounds = array<i64: 3, 256, 128>}, {pipeline_mode = #tpu.pipeline_mode<synchronous>, transform_indices = @transform_6, window_bounds = array<i64: 1, 128>}, {pipeline_mode = #tpu.pipeline_mode<synchronous>, transform_indices = @transform_7, window_bounds = array<i64: 128, 4>}, {pipeline_mode = #tpu.pipeline_mode<synchronous>, transform_indices = @transform_8, window_bounds = array<i64: 1, 4>}, {transform_indices = @transform_9, window_bounds = array<i64: 8, 4>}]} {
    %c0 = arith.constant 0 : index
    %c0_0 = arith.constant 0 : index
    %0 = vector.load %arg1[%c0, %c0_0] : memref<8x320xbf16, #tpu.memory_space<vmem>>, vector<8x32xbf16>
    %c0_1 = arith.constant 0 : index
    %c0_2 = arith.constant 0 : index
    %1 = vector.load %arg2[%c0_1, %c0_2] : memref<32x256xbf16, #tpu.memory_space<vmem>>, vector<32x256xbf16>
    %cst = arith.constant dense<0.000000e+00> : vector<8x256xf32>
    %2 = tpu.matmul %0, %1, %cst {dimension_numbers = #tpu.dot_dimension_numbers<[1], [0], [0], [1], [0, 0, 1, 1], [], []>} : vector<8x32xbf16>, vector<32x256xbf16>, vector<8x256xf32> -> vector<8x256xf32>
    %c0_3 = arith.constant 0 : index
    %c16 = arith.constant 16 : index
    %3 = vector.load %arg1[%c0_3, %c16] : memref<8x320xbf16, #tpu.memory_space<vmem>>, vector<8x32xbf16>
    %c0_4 = arith.constant 0 : index
    %c0_5 = arith.constant 0 : index
    %4 = vector.load %arg2[%c0_4, %c0_5] : memref<32x256xbf16, #tpu.memory_space<vmem>>, vector<32x256xbf16>
    %cst_6 = arith.constant dense<0.000000e+00> : vector<8x256xf32>
    %5 = tpu.matmul %3, %4, %cst_6 {dimension_numbers = #tpu.dot_dimension_numbers<[1], [0], [0], [1], [0, 0, 1, 1], [], []>} : vector<8x32xbf16>, vector<32x256xbf16>, vector<8x256xf32> -> vector<8x256xf32>
    %6 = arith.maximumf %2, %5 : vector<8x256xf32>
    %c0_7 = arith.constant 0 : index
    %c32 = arith.constant 32 : index
    %7 = vector.load %arg1[%c0_7, %c32] : memref<8x320xbf16, #tpu.memory_space<vmem>>, vector<8x32xbf16>
    %c0_8 = arith.constant 0 : index
    %c0_9 = arith.constant 0 : index
    %8 = vector.load %arg2[%c0_8, %c0_9] : memref<32x256xbf16, #tpu.memory_space<vmem>>, vector<32x256xbf16>
    %cst_10 = arith.constant dense<0.000000e+00> : vector<8x256xf32>
    %9 = tpu.matmul %7, %8, %cst_10 {dimension_numbers = #tpu.dot_dimension_numbers<[1], [0], [0], [1], [0, 0, 1, 1], [], []>} : vector<8x32xbf16>, vector<32x256xbf16>, vector<8x256xf32> -> vector<8x256xf32>
    %10 = arith.maximumf %6, %9 : vector<8x256xf32>
    %c0_11 = arith.constant 0 : index
    %c48 = arith.constant 48 : index
    %11 = vector.load %arg1[%c0_11, %c48] : memref<8x320xbf16, #tpu.memory_space<vmem>>, vector<8x32xbf16>
    %c0_12 = arith.constant 0 : index
    %c0_13 = arith.constant 0 : index
    %12 = vector.load %arg2[%c0_12, %c0_13] : memref<32x256xbf16, #tpu.memory_space<vmem>>, vector<32x256xbf16>
    %cst_14 = arith.constant dense<0.000000e+00> : vector<8x256xf32>
    %13 = tpu.matmul %11, %12, %cst_14 {dimension_numbers = #tpu.dot_dimension_numbers<[1], [0], [0], [1], [0, 0, 1, 1], [], []>} : vector<8x32xbf16>, vector<32x256xbf16>, vector<8x256xf32> -> vector<8x256xf32>
    %14 = arith.maximumf %10, %13 : vector<8x256xf32>
    %c0_15 = arith.constant 0 : index
    %c64 = arith.constant 64 : index
    %15 = vector.load %arg1[%c0_15, %c64] : memref<8x320xbf16, #tpu.memory_space<vmem>>, vector<8x32xbf16>
    %c0_16 = arith.constant 0 : index
    %c0_17 = arith.constant 0 : index
    %16 = vector.load %arg2[%c0_16, %c0_17] : memref<32x256xbf16, #tpu.memory_space<vmem>>, vector<32x256xbf16>
    %cst_18 = arith.constant dense<0.000000e+00> : vector<8x256xf32>
    %17 = tpu.matmul %15, %16, %cst_18 {dimension_numbers = #tpu.dot_dimension_numbers<[1], [0], [0], [1], [0, 0, 1, 1], [], []>} : vector<8x32xbf16>, vector<32x256xbf16>, vector<8x256xf32> -> vector<8x256xf32>
    %18 = arith.maximumf %14, %17 : vector<8x256xf32>
    %c0_19 = arith.constant 0 : index
    %c80 = arith.constant 80 : index
    %19 = vector.load %arg1[%c0_19, %c80] : memref<8x320xbf16, #tpu.memory_space<vmem>>, vector<8x32xbf16>
    %c0_20 = arith.constant 0 : index
    %c0_21 = arith.constant 0 : index
    %20 = vector.load %arg2[%c0_20, %c0_21] : memref<32x256xbf16, #tpu.memory_space<vmem>>, vector<32x256xbf16>
    %cst_22 = arith.constant dense<0.000000e+00> : vector<8x256xf32>
    %21 = tpu.matmul %19, %20, %cst_22 {dimension_numbers = #tpu.dot_dimension_numbers<[1], [0], [0], [1], [0, 0, 1, 1], [], []>} : vector<8x32xbf16>, vector<32x256xbf16>, vector<8x256xf32> -> vector<8x256xf32>
    %22 = arith.maximumf %18, %21 : vector<8x256xf32>
    %c0_23 = arith.constant 0 : index
    %c96 = arith.constant 96 : index
    %23 = vector.load %arg1[%c0_23, %c96] : memref<8x320xbf16, #tpu.memory_space<vmem>>, vector<8x32xbf16>
    %c0_24 = arith.constant 0 : index
    %c0_25 = arith.constant 0 : index
    %24 = vector.load %arg2[%c0_24, %c0_25] : memref<32x256xbf16, #tpu.memory_space<vmem>>, vector<32x256xbf16>
    %cst_26 = arith.constant dense<0.000000e+00> : vector<8x256xf32>
    %25 = tpu.matmul %23, %24, %cst_26 {dimension_numbers = #tpu.dot_dimension_numbers<[1], [0], [0], [1], [0, 0, 1, 1], [], []>} : vector<8x32xbf16>, vector<32x256xbf16>, vector<8x256xf32> -> vector<8x256xf32>
    %26 = arith.maximumf %22, %25 : vector<8x256xf32>
    %c0_27 = arith.constant 0 : index
    %c112 = arith.constant 112 : index
    %27 = vector.load %arg1[%c0_27, %c112] : memref<8x320xbf16, #tpu.memory_space<vmem>>, vector<8x32xbf16>
    %c0_28 = arith.constant 0 : index
    %c0_29 = arith.constant 0 : index
    %28 = vector.load %arg2[%c0_28, %c0_29] : memref<32x256xbf16, #tpu.memory_space<vmem>>, vector<32x256xbf16>
    %cst_30 = arith.constant dense<0.000000e+00> : vector<8x256xf32>
    %29 = tpu.matmul %27, %28, %cst_30 {dimension_numbers = #tpu.dot_dimension_numbers<[1], [0], [0], [1], [0, 0, 1, 1], [], []>} : vector<8x32xbf16>, vector<32x256xbf16>, vector<8x256xf32> -> vector<8x256xf32>
    %30 = arith.maximumf %26, %29 : vector<8x256xf32>
    %c0_31 = arith.constant 0 : index
    %c128 = arith.constant 128 : index
    %31 = vector.load %arg1[%c0_31, %c128] : memref<8x320xbf16, #tpu.memory_space<vmem>>, vector<8x32xbf16>
    %c0_32 = arith.constant 0 : index
    %c0_33 = arith.constant 0 : index
    %32 = vector.load %arg2[%c0_32, %c0_33] : memref<32x256xbf16, #tpu.memory_space<vmem>>, vector<32x256xbf16>
    %cst_34 = arith.constant dense<0.000000e+00> : vector<8x256xf32>
    %33 = tpu.matmul %31, %32, %cst_34 {dimension_numbers = #tpu.dot_dimension_numbers<[1], [0], [0], [1], [0, 0, 1, 1], [], []>} : vector<8x32xbf16>, vector<32x256xbf16>, vector<8x256xf32> -> vector<8x256xf32>
    %34 = arith.maximumf %30, %33 : vector<8x256xf32>
    %c0_35 = arith.constant 0 : index
    %c144 = arith.constant 144 : index
    %35 = vector.load %arg1[%c0_35, %c144] : memref<8x320xbf16, #tpu.memory_space<vmem>>, vector<8x32xbf16>
    %c0_36 = arith.constant 0 : index
    %c0_37 = arith.constant 0 : index
    %36 = vector.load %arg2[%c0_36, %c0_37] : memref<32x256xbf16, #tpu.memory_space<vmem>>, vector<32x256xbf16>
    %cst_38 = arith.constant dense<0.000000e+00> : vector<8x256xf32>
    %37 = tpu.matmul %35, %36, %cst_38 {dimension_numbers = #tpu.dot_dimension_numbers<[1], [0], [0], [1], [0, 0, 1, 1], [], []>} : vector<8x32xbf16>, vector<32x256xbf16>, vector<8x256xf32> -> vector<8x256xf32>
    %38 = arith.maximumf %34, %37 : vector<8x256xf32>
    %c0_39 = arith.constant 0 : index
    %c160 = arith.constant 160 : index
    %39 = vector.load %arg1[%c0_39, %c160] : memref<8x320xbf16, #tpu.memory_space<vmem>>, vector<8x32xbf16>
    %c0_40 = arith.constant 0 : index
    %c0_41 = arith.constant 0 : index
    %40 = vector.load %arg2[%c0_40, %c0_41] : memref<32x256xbf16, #tpu.memory_space<vmem>>, vector<32x256xbf16>
    %cst_42 = arith.constant dense<0.000000e+00> : vector<8x256xf32>
    %41 = tpu.matmul %39, %40, %cst_42 {dimension_numbers = #tpu.dot_dimension_numbers<[1], [0], [0], [1], [0, 0, 1, 1], [], []>} : vector<8x32xbf16>, vector<32x256xbf16>, vector<8x256xf32> -> vector<8x256xf32>
    %42 = arith.maximumf %38, %41 : vector<8x256xf32>
    %c0_43 = arith.constant 0 : index
    %c176 = arith.constant 176 : index
    %43 = vector.load %arg1[%c0_43, %c176] : memref<8x320xbf16, #tpu.memory_space<vmem>>, vector<8x32xbf16>
    %c0_44 = arith.constant 0 : index
    %c0_45 = arith.constant 0 : index
    %44 = vector.load %arg2[%c0_44, %c0_45] : memref<32x256xbf16, #tpu.memory_space<vmem>>, vector<32x256xbf16>
    %cst_46 = arith.constant dense<0.000000e+00> : vector<8x256xf32>
    %45 = tpu.matmul %43, %44, %cst_46 {dimension_numbers = #tpu.dot_dimension_numbers<[1], [0], [0], [1], [0, 0, 1, 1], [], []>} : vector<8x32xbf16>, vector<32x256xbf16>, vector<8x256xf32> -> vector<8x256xf32>
    %46 = arith.maximumf %42, %45 : vector<8x256xf32>
    %c0_47 = arith.constant 0 : index
    %c192 = arith.constant 192 : index
    %47 = vector.load %arg1[%c0_47, %c192] : memref<8x320xbf16, #tpu.memory_space<vmem>>, vector<8x32xbf16>
    %c0_48 = arith.constant 0 : index
    %c0_49 = arith.constant 0 : index
    %48 = vector.load %arg2[%c0_48, %c0_49] : memref<32x256xbf16, #tpu.memory_space<vmem>>, vector<32x256xbf16>
    %cst_50 = arith.constant dense<0.000000e+00> : vector<8x256xf32>
    %49 = tpu.matmul %47, %48, %cst_50 {dimension_numbers = #tpu.dot_dimension_numbers<[1], [0], [0], [1], [0, 0, 1, 1], [], []>} : vector<8x32xbf16>, vector<32x256xbf16>, vector<8x256xf32> -> vector<8x256xf32>
    %50 = arith.maximumf %46, %49 : vector<8x256xf32>
    %c0_51 = arith.constant 0 : index
    %c208 = arith.constant 208 : index
    %51 = vector.load %arg1[%c0_51, %c208] : memref<8x320xbf16, #tpu.memory_space<vmem>>, vector<8x32xbf16>
    %c0_52 = arith.constant 0 : index
    %c0_53 = arith.constant 0 : index
    %52 = vector.load %arg2[%c0_52, %c0_53] : memref<32x256xbf16, #tpu.memory_space<vmem>>, vector<32x256xbf16>
    %cst_54 = arith.constant dense<0.000000e+00> : vector<8x256xf32>
    %53 = tpu.matmul %51, %52, %cst_54 {dimension_numbers = #tpu.dot_dimension_numbers<[1], [0], [0], [1], [0, 0, 1, 1], [], []>} : vector<8x32xbf16>, vector<32x256xbf16>, vector<8x256xf32> -> vector<8x256xf32>
    %54 = arith.maximumf %50, %53 : vector<8x256xf32>
    %c0_55 = arith.constant 0 : index
    %c224 = arith.constant 224 : index
    %55 = vector.load %arg1[%c0_55, %c224] : memref<8x320xbf16, #tpu.memory_space<vmem>>, vector<8x32xbf16>
    %c0_56 = arith.constant 0 : index
    %c0_57 = arith.constant 0 : index
    %56 = vector.load %arg2[%c0_56, %c0_57] : memref<32x256xbf16, #tpu.memory_space<vmem>>, vector<32x256xbf16>
    %cst_58 = arith.constant dense<0.000000e+00> : vector<8x256xf32>
    %57 = tpu.matmul %55, %56, %cst_58 {dimension_numbers = #tpu.dot_dimension_numbers<[1], [0], [0], [1], [0, 0, 1, 1], [], []>} : vector<8x32xbf16>, vector<32x256xbf16>, vector<8x256xf32> -> vector<8x256xf32>
    %58 = arith.maximumf %54, %57 : vector<8x256xf32>
    %c0_59 = arith.constant 0 : index
    %c240 = arith.constant 240 : index
    %59 = vector.load %arg1[%c0_59, %c240] : memref<8x320xbf16, #tpu.memory_space<vmem>>, vector<8x32xbf16>
    %c0_60 = arith.constant 0 : index
    %c0_61 = arith.constant 0 : index
    %60 = vector.load %arg2[%c0_60, %c0_61] : memref<32x256xbf16, #tpu.memory_space<vmem>>, vector<32x256xbf16>
    %cst_62 = arith.constant dense<0.000000e+00> : vector<8x256xf32>
    %61 = tpu.matmul %59, %60, %cst_62 {dimension_numbers = #tpu.dot_dimension_numbers<[1], [0], [0], [1], [0, 0, 1, 1], [], []>} : vector<8x32xbf16>, vector<32x256xbf16>, vector<8x256xf32> -> vector<8x256xf32>
    %62 = arith.maximumf %58, %61 : vector<8x256xf32>
    %c0_63 = arith.constant 0 : index
    %c256 = arith.constant 256 : index
    %63 = vector.load %arg1[%c0_63, %c256] : memref<8x320xbf16, #tpu.memory_space<vmem>>, vector<8x32xbf16>
    %c0_64 = arith.constant 0 : index
    %c0_65 = arith.constant 0 : index
    %64 = vector.load %arg2[%c0_64, %c0_65] : memref<32x256xbf16, #tpu.memory_space<vmem>>, vector<32x256xbf16>
    %cst_66 = arith.constant dense<0.000000e+00> : vector<8x256xf32>
    %65 = tpu.matmul %63, %64, %cst_66 {dimension_numbers = #tpu.dot_dimension_numbers<[1], [0], [0], [1], [0, 0, 1, 1], [], []>} : vector<8x32xbf16>, vector<32x256xbf16>, vector<8x256xf32> -> vector<8x256xf32>
    %66 = arith.maximumf %62, %65 : vector<8x256xf32>
    %c0_67 = arith.constant 0 : index
    %c272 = arith.constant 272 : index
    %67 = vector.load %arg1[%c0_67, %c272] : memref<8x320xbf16, #tpu.memory_space<vmem>>, vector<8x32xbf16>
    %c0_68 = arith.constant 0 : index
    %c0_69 = arith.constant 0 : index
    %68 = vector.load %arg2[%c0_68, %c0_69] : memref<32x256xbf16, #tpu.memory_space<vmem>>, vector<32x256xbf16>
    %cst_70 = arith.constant dense<0.000000e+00> : vector<8x256xf32>
    %69 = tpu.matmul %67, %68, %cst_70 {dimension_numbers = #tpu.dot_dimension_numbers<[1], [0], [0], [1], [0, 0, 1, 1], [], []>} : vector<8x32xbf16>, vector<32x256xbf16>, vector<8x256xf32> -> vector<8x256xf32>
    %70 = arith.maximumf %66, %69 : vector<8x256xf32>
    %c0_71 = arith.constant 0 : index
    %c288 = arith.constant 288 : index
    %71 = vector.load %arg1[%c0_71, %c288] : memref<8x320xbf16, #tpu.memory_space<vmem>>, vector<8x32xbf16>
    %c0_72 = arith.constant 0 : index
    %c0_73 = arith.constant 0 : index
    %72 = vector.load %arg2[%c0_72, %c0_73] : memref<32x256xbf16, #tpu.memory_space<vmem>>, vector<32x256xbf16>
    %cst_74 = arith.constant dense<0.000000e+00> : vector<8x256xf32>
    %73 = tpu.matmul %71, %72, %cst_74 {dimension_numbers = #tpu.dot_dimension_numbers<[1], [0], [0], [1], [0, 0, 1, 1], [], []>} : vector<8x32xbf16>, vector<32x256xbf16>, vector<8x256xf32> -> vector<8x256xf32>
    %74 = arith.maximumf %70, %73 : vector<8x256xf32>
    %c0_75 = arith.constant 0 : index
    %c0_76 = arith.constant 0 : index
    %c0_77 = arith.constant 0 : index
    %75 = vector.load %arg5[%c0_75, %c0_76, %c0_77] : memref<3x1x256xf32, #tpu.memory_space<vmem>>, vector<1x1x256xf32>
    %76 = vector.shape_cast %75 : vector<1x1x256xf32> to vector<1x256xf32>
    %77 = vector.broadcast %76 : vector<1x256xf32> to vector<8x256xf32>
    %78 = arith.addf %74, %77 : vector<8x256xf32>
    %cst_78 = arith.constant 0.000000e+00 : f32
    %79 = vector.broadcast %cst_78 : f32 to vector<8x256xf32>
    %80 = arith.maximumf %78, %79 : vector<8x256xf32>
    %c0_79 = arith.constant 0 : index
    %c0_80 = arith.constant 0 : index
    %81 = vector.load %arg1[%c0_79, %c0_80] : memref<8x320xbf16, #tpu.memory_space<vmem>>, vector<8x48xbf16>
    %c0_81 = arith.constant 0 : index
    %c0_82 = arith.constant 0 : index
    %82 = vector.load %arg3[%c0_81, %c0_82] : memref<48x256xbf16, #tpu.memory_space<vmem>>, vector<48x256xbf16>
    %cst_83 = arith.constant dense<0.000000e+00> : vector<8x256xf32>
    %83 = tpu.matmul %81, %82, %cst_83 {dimension_numbers = #tpu.dot_dimension_numbers<[1], [0], [0], [1], [0, 0, 1, 1], [], []>} : vector<8x48xbf16>, vector<48x256xbf16>, vector<8x256xf32> -> vector<8x256xf32>
    %c0_84 = arith.constant 0 : index
    %c16_85 = arith.constant 16 : index
    %84 = vector.load %arg1[%c0_84, %c16_85] : memref<8x320xbf16, #tpu.memory_space<vmem>>, vector<8x48xbf16>
    %c0_86 = arith.constant 0 : index
    %c0_87 = arith.constant 0 : index
    %85 = vector.load %arg3[%c0_86, %c0_87] : memref<48x256xbf16, #tpu.memory_space<vmem>>, vector<48x256xbf16>
    %cst_88 = arith.constant dense<0.000000e+00> : vector<8x256xf32>
    %86 = tpu.matmul %84, %85, %cst_88 {dimension_numbers = #tpu.dot_dimension_numbers<[1], [0], [0], [1], [0, 0, 1, 1], [], []>} : vector<8x48xbf16>, vector<48x256xbf16>, vector<8x256xf32> -> vector<8x256xf32>
    %87 = arith.maximumf %83, %86 : vector<8x256xf32>
    %c0_89 = arith.constant 0 : index
    %c32_90 = arith.constant 32 : index
    %88 = vector.load %arg1[%c0_89, %c32_90] : memref<8x320xbf16, #tpu.memory_space<vmem>>, vector<8x48xbf16>
    %c0_91 = arith.constant 0 : index
    %c0_92 = arith.constant 0 : index
    %89 = vector.load %arg3[%c0_91, %c0_92] : memref<48x256xbf16, #tpu.memory_space<vmem>>, vector<48x256xbf16>
    %cst_93 = arith.constant dense<0.000000e+00> : vector<8x256xf32>
    %90 = tpu.matmul %88, %89, %cst_93 {dimension_numbers = #tpu.dot_dimension_numbers<[1], [0], [0], [1], [0, 0, 1, 1], [], []>} : vector<8x48xbf16>, vector<48x256xbf16>, vector<8x256xf32> -> vector<8x256xf32>
    %91 = arith.maximumf %87, %90 : vector<8x256xf32>
    %c0_94 = arith.constant 0 : index
    %c48_95 = arith.constant 48 : index
    %92 = vector.load %arg1[%c0_94, %c48_95] : memref<8x320xbf16, #tpu.memory_space<vmem>>, vector<8x48xbf16>
    %c0_96 = arith.constant 0 : index
    %c0_97 = arith.constant 0 : index
    %93 = vector.load %arg3[%c0_96, %c0_97] : memref<48x256xbf16, #tpu.memory_space<vmem>>, vector<48x256xbf16>
    %cst_98 = arith.constant dense<0.000000e+00> : vector<8x256xf32>
    %94 = tpu.matmul %92, %93, %cst_98 {dimension_numbers = #tpu.dot_dimension_numbers<[1], [0], [0], [1], [0, 0, 1, 1], [], []>} : vector<8x48xbf16>, vector<48x256xbf16>, vector<8x256xf32> -> vector<8x256xf32>
    %95 = arith.maximumf %91, %94 : vector<8x256xf32>
    %c0_99 = arith.constant 0 : index
    %c64_100 = arith.constant 64 : index
    %96 = vector.load %arg1[%c0_99, %c64_100] : memref<8x320xbf16, #tpu.memory_space<vmem>>, vector<8x48xbf16>
    %c0_101 = arith.constant 0 : index
    %c0_102 = arith.constant 0 : index
    %97 = vector.load %arg3[%c0_101, %c0_102] : memref<48x256xbf16, #tpu.memory_space<vmem>>, vector<48x256xbf16>
    %cst_103 = arith.constant dense<0.000000e+00> : vector<8x256xf32>
    %98 = tpu.matmul %96, %97, %cst_103 {dimension_numbers = #tpu.dot_dimension_numbers<[1], [0], [0], [1], [0, 0, 1, 1], [], []>} : vector<8x48xbf16>, vector<48x256xbf16>, vector<8x256xf32> -> vector<8x256xf32>
    %99 = arith.maximumf %95, %98 : vector<8x256xf32>
    %c0_104 = arith.constant 0 : index
    %c80_105 = arith.constant 80 : index
    %100 = vector.load %arg1[%c0_104, %c80_105] : memref<8x320xbf16, #tpu.memory_space<vmem>>, vector<8x48xbf16>
    %c0_106 = arith.constant 0 : index
    %c0_107 = arith.constant 0 : index
    %101 = vector.load %arg3[%c0_106, %c0_107] : memref<48x256xbf16, #tpu.memory_space<vmem>>, vector<48x256xbf16>
    %cst_108 = arith.constant dense<0.000000e+00> : vector<8x256xf32>
    %102 = tpu.matmul %100, %101, %cst_108 {dimension_numbers = #tpu.dot_dimension_numbers<[1], [0], [0], [1], [0, 0, 1, 1], [], []>} : vector<8x48xbf16>, vector<48x256xbf16>, vector<8x256xf32> -> vector<8x256xf32>
    %103 = arith.maximumf %99, %102 : vector<8x256xf32>
    %c0_109 = arith.constant 0 : index
    %c96_110 = arith.constant 96 : index
    %104 = vector.load %arg1[%c0_109, %c96_110] : memref<8x320xbf16, #tpu.memory_space<vmem>>, vector<8x48xbf16>
    %c0_111 = arith.constant 0 : index
    %c0_112 = arith.constant 0 : index
    %105 = vector.load %arg3[%c0_111, %c0_112] : memref<48x256xbf16, #tpu.memory_space<vmem>>, vector<48x256xbf16>
    %cst_113 = arith.constant dense<0.000000e+00> : vector<8x256xf32>
    %106 = tpu.matmul %104, %105, %cst_113 {dimension_numbers = #tpu.dot_dimension_numbers<[1], [0], [0], [1], [0, 0, 1, 1], [], []>} : vector<8x48xbf16>, vector<48x256xbf16>, vector<8x256xf32> -> vector<8x256xf32>
    %107 = arith.maximumf %103, %106 : vector<8x256xf32>
    %c0_114 = arith.constant 0 : index
    %c112_115 = arith.constant 112 : index
    %108 = vector.load %arg1[%c0_114, %c112_115] : memref<8x320xbf16, #tpu.memory_space<vmem>>, vector<8x48xbf16>
    %c0_116 = arith.constant 0 : index
    %c0_117 = arith.constant 0 : index
    %109 = vector.load %arg3[%c0_116, %c0_117] : memref<48x256xbf16, #tpu.memory_space<vmem>>, vector<48x256xbf16>
    %cst_118 = arith.constant dense<0.000000e+00> : vector<8x256xf32>
    %110 = tpu.matmul %108, %109, %cst_118 {dimension_numbers = #tpu.dot_dimension_numbers<[1], [0], [0], [1], [0, 0, 1, 1], [], []>} : vector<8x48xbf16>, vector<48x256xbf16>, vector<8x256xf32> -> vector<8x256xf32>
    %111 = arith.maximumf %107, %110 : vector<8x256xf32>
    %c0_119 = arith.constant 0 : index
    %c128_120 = arith.constant 128 : index
    %112 = vector.load %arg1[%c0_119, %c128_120] : memref<8x320xbf16, #tpu.memory_space<vmem>>, vector<8x48xbf16>
    %c0_121 = arith.constant 0 : index
    %c0_122 = arith.constant 0 : index
    %113 = vector.load %arg3[%c0_121, %c0_122] : memref<48x256xbf16, #tpu.memory_space<vmem>>, vector<48x256xbf16>
    %cst_123 = arith.constant dense<0.000000e+00> : vector<8x256xf32>
    %114 = tpu.matmul %112, %113, %cst_123 {dimension_numbers = #tpu.dot_dimension_numbers<[1], [0], [0], [1], [0, 0, 1, 1], [], []>} : vector<8x48xbf16>, vector<48x256xbf16>, vector<8x256xf32> -> vector<8x256xf32>
    %115 = arith.maximumf %111, %114 : vector<8x256xf32>
    %c0_124 = arith.constant 0 : index
    %c144_125 = arith.constant 144 : index
    %116 = vector.load %arg1[%c0_124, %c144_125] : memref<8x320xbf16, #tpu.memory_space<vmem>>, vector<8x48xbf16>
    %c0_126 = arith.constant 0 : index
    %c0_127 = arith.constant 0 : index
    %117 = vector.load %arg3[%c0_126, %c0_127] : memref<48x256xbf16, #tpu.memory_space<vmem>>, vector<48x256xbf16>
    %cst_128 = arith.constant dense<0.000000e+00> : vector<8x256xf32>
    %118 = tpu.matmul %116, %117, %cst_128 {dimension_numbers = #tpu.dot_dimension_numbers<[1], [0], [0], [1], [0, 0, 1, 1], [], []>} : vector<8x48xbf16>, vector<48x256xbf16>, vector<8x256xf32> -> vector<8x256xf32>
    %119 = arith.maximumf %115, %118 : vector<8x256xf32>
    %c0_129 = arith.constant 0 : index
    %c160_130 = arith.constant 160 : index
    %120 = vector.load %arg1[%c0_129, %c160_130] : memref<8x320xbf16, #tpu.memory_space<vmem>>, vector<8x48xbf16>
    %c0_131 = arith.constant 0 : index
    %c0_132 = arith.constant 0 : index
    %121 = vector.load %arg3[%c0_131, %c0_132] : memref<48x256xbf16, #tpu.memory_space<vmem>>, vector<48x256xbf16>
    %cst_133 = arith.constant dense<0.000000e+00> : vector<8x256xf32>
    %122 = tpu.matmul %120, %121, %cst_133 {dimension_numbers = #tpu.dot_dimension_numbers<[1], [0], [0], [1], [0, 0, 1, 1], [], []>} : vector<8x48xbf16>, vector<48x256xbf16>, vector<8x256xf32> -> vector<8x256xf32>
    %123 = arith.maximumf %119, %122 : vector<8x256xf32>
    %c0_134 = arith.constant 0 : index
    %c176_135 = arith.constant 176 : index
    %124 = vector.load %arg1[%c0_134, %c176_135] : memref<8x320xbf16, #tpu.memory_space<vmem>>, vector<8x48xbf16>
    %c0_136 = arith.constant 0 : index
    %c0_137 = arith.constant 0 : index
    %125 = vector.load %arg3[%c0_136, %c0_137] : memref<48x256xbf16, #tpu.memory_space<vmem>>, vector<48x256xbf16>
    %cst_138 = arith.constant dense<0.000000e+00> : vector<8x256xf32>
    %126 = tpu.matmul %124, %125, %cst_138 {dimension_numbers = #tpu.dot_dimension_numbers<[1], [0], [0], [1], [0, 0, 1, 1], [], []>} : vector<8x48xbf16>, vector<48x256xbf16>, vector<8x256xf32> -> vector<8x256xf32>
    %127 = arith.maximumf %123, %126 : vector<8x256xf32>
    %c0_139 = arith.constant 0 : index
    %c192_140 = arith.constant 192 : index
    %128 = vector.load %arg1[%c0_139, %c192_140] : memref<8x320xbf16, #tpu.memory_space<vmem>>, vector<8x48xbf16>
    %c0_141 = arith.constant 0 : index
    %c0_142 = arith.constant 0 : index
    %129 = vector.load %arg3[%c0_141, %c0_142] : memref<48x256xbf16, #tpu.memory_space<vmem>>, vector<48x256xbf16>
    %cst_143 = arith.constant dense<0.000000e+00> : vector<8x256xf32>
    %130 = tpu.matmul %128, %129, %cst_143 {dimension_numbers = #tpu.dot_dimension_numbers<[1], [0], [0], [1], [0, 0, 1, 1], [], []>} : vector<8x48xbf16>, vector<48x256xbf16>, vector<8x256xf32> -> vector<8x256xf32>
    %131 = arith.maximumf %127, %130 : vector<8x256xf32>
    %c0_144 = arith.constant 0 : index
    %c208_145 = arith.constant 208 : index
    %132 = vector.load %arg1[%c0_144, %c208_145] : memref<8x320xbf16, #tpu.memory_space<vmem>>, vector<8x48xbf16>
    %c0_146 = arith.constant 0 : index
    %c0_147 = arith.constant 0 : index
    %133 = vector.load %arg3[%c0_146, %c0_147] : memref<48x256xbf16, #tpu.memory_space<vmem>>, vector<48x256xbf16>
    %cst_148 = arith.constant dense<0.000000e+00> : vector<8x256xf32>
    %134 = tpu.matmul %132, %133, %cst_148 {dimension_numbers = #tpu.dot_dimension_numbers<[1], [0], [0], [1], [0, 0, 1, 1], [], []>} : vector<8x48xbf16>, vector<48x256xbf16>, vector<8x256xf32> -> vector<8x256xf32>
    %135 = arith.maximumf %131, %134 : vector<8x256xf32>
    %c0_149 = arith.constant 0 : index
    %c224_150 = arith.constant 224 : index
    %136 = vector.load %arg1[%c0_149, %c224_150] : memref<8x320xbf16, #tpu.memory_space<vmem>>, vector<8x48xbf16>
    %c0_151 = arith.constant 0 : index
    %c0_152 = arith.constant 0 : index
    %137 = vector.load %arg3[%c0_151, %c0_152] : memref<48x256xbf16, #tpu.memory_space<vmem>>, vector<48x256xbf16>
    %cst_153 = arith.constant dense<0.000000e+00> : vector<8x256xf32>
    %138 = tpu.matmul %136, %137, %cst_153 {dimension_numbers = #tpu.dot_dimension_numbers<[1], [0], [0], [1], [0, 0, 1, 1], [], []>} : vector<8x48xbf16>, vector<48x256xbf16>, vector<8x256xf32> -> vector<8x256xf32>
    %139 = arith.maximumf %135, %138 : vector<8x256xf32>
    %c0_154 = arith.constant 0 : index
    %c240_155 = arith.constant 240 : index
    %140 = vector.load %arg1[%c0_154, %c240_155] : memref<8x320xbf16, #tpu.memory_space<vmem>>, vector<8x48xbf16>
    %c0_156 = arith.constant 0 : index
    %c0_157 = arith.constant 0 : index
    %141 = vector.load %arg3[%c0_156, %c0_157] : memref<48x256xbf16, #tpu.memory_space<vmem>>, vector<48x256xbf16>
    %cst_158 = arith.constant dense<0.000000e+00> : vector<8x256xf32>
    %142 = tpu.matmul %140, %141, %cst_158 {dimension_numbers = #tpu.dot_dimension_numbers<[1], [0], [0], [1], [0, 0, 1, 1], [], []>} : vector<8x48xbf16>, vector<48x256xbf16>, vector<8x256xf32> -> vector<8x256xf32>
    %143 = arith.maximumf %139, %142 : vector<8x256xf32>
    %c0_159 = arith.constant 0 : index
    %c256_160 = arith.constant 256 : index
    %144 = vector.load %arg1[%c0_159, %c256_160] : memref<8x320xbf16, #tpu.memory_space<vmem>>, vector<8x48xbf16>
    %c0_161 = arith.constant 0 : index
    %c0_162 = arith.constant 0 : index
    %145 = vector.load %arg3[%c0_161, %c0_162] : memref<48x256xbf16, #tpu.memory_space<vmem>>, vector<48x256xbf16>
    %cst_163 = arith.constant dense<0.000000e+00> : vector<8x256xf32>
    %146 = tpu.matmul %144, %145, %cst_163 {dimension_numbers = #tpu.dot_dimension_numbers<[1], [0], [0], [1], [0, 0, 1, 1], [], []>} : vector<8x48xbf16>, vector<48x256xbf16>, vector<8x256xf32> -> vector<8x256xf32>
    %147 = arith.maximumf %143, %146 : vector<8x256xf32>
    %c0_164 = arith.constant 0 : index
    %c272_165 = arith.constant 272 : index
    %148 = vector.load %arg1[%c0_164, %c272_165] : memref<8x320xbf16, #tpu.memory_space<vmem>>, vector<8x48xbf16>
    %c0_166 = arith.constant 0 : index
    %c0_167 = arith.constant 0 : index
    %149 = vector.load %arg3[%c0_166, %c0_167] : memref<48x256xbf16, #tpu.memory_space<vmem>>, vector<48x256xbf16>
    %cst_168 = arith.constant dense<0.000000e+00> : vector<8x256xf32>
    %150 = tpu.matmul %148, %149, %cst_168 {dimension_numbers = #tpu.dot_dimension_numbers<[1], [0], [0], [1], [0, 0, 1, 1], [], []>} : vector<8x48xbf16>, vector<48x256xbf16>, vector<8x256xf32> -> vector<8x256xf32>
    %151 = arith.maximumf %147, %150 : vector<8x256xf32>
    %c1 = arith.constant 1 : index
    %c0_169 = arith.constant 0 : index
    %c0_170 = arith.constant 0 : index
    %152 = vector.load %arg5[%c1, %c0_169, %c0_170] : memref<3x1x256xf32, #tpu.memory_space<vmem>>, vector<1x1x256xf32>
    %153 = vector.shape_cast %152 : vector<1x1x256xf32> to vector<1x256xf32>
    %154 = vector.broadcast %153 : vector<1x256xf32> to vector<8x256xf32>
    %155 = arith.addf %151, %154 : vector<8x256xf32>
    %cst_171 = arith.constant 0.000000e+00 : f32
    %156 = vector.broadcast %cst_171 : f32 to vector<8x256xf32>
    %157 = arith.maximumf %155, %156 : vector<8x256xf32>
    %c0_172 = arith.constant 0 : index
    %c0_173 = arith.constant 0 : index
    %158 = vector.load %arg1[%c0_172, %c0_173] : memref<8x320xbf16, #tpu.memory_space<vmem>>, vector<8x64xbf16>
    %c0_174 = arith.constant 0 : index
    %c0_175 = arith.constant 0 : index
    %159 = vector.load %arg4[%c0_174, %c0_175] : memref<64x256xbf16, #tpu.memory_space<vmem>>, vector<64x256xbf16>
    %cst_176 = arith.constant dense<0.000000e+00> : vector<8x256xf32>
    %160 = tpu.matmul %158, %159, %cst_176 {dimension_numbers = #tpu.dot_dimension_numbers<[1], [0], [0], [1], [0, 0, 1, 1], [], []>} : vector<8x64xbf16>, vector<64x256xbf16>, vector<8x256xf32> -> vector<8x256xf32>
    %c0_177 = arith.constant 0 : index
    %c16_178 = arith.constant 16 : index
    %161 = vector.load %arg1[%c0_177, %c16_178] : memref<8x320xbf16, #tpu.memory_space<vmem>>, vector<8x64xbf16>
    %c0_179 = arith.constant 0 : index
    %c0_180 = arith.constant 0 : index
    %162 = vector.load %arg4[%c0_179, %c0_180] : memref<64x256xbf16, #tpu.memory_space<vmem>>, vector<64x256xbf16>
    %cst_181 = arith.constant dense<0.000000e+00> : vector<8x256xf32>
    %163 = tpu.matmul %161, %162, %cst_181 {dimension_numbers = #tpu.dot_dimension_numbers<[1], [0], [0], [1], [0, 0, 1, 1], [], []>} : vector<8x64xbf16>, vector<64x256xbf16>, vector<8x256xf32> -> vector<8x256xf32>
    %164 = arith.maximumf %160, %163 : vector<8x256xf32>
    %c0_182 = arith.constant 0 : index
    %c32_183 = arith.constant 32 : index
    %165 = vector.load %arg1[%c0_182, %c32_183] : memref<8x320xbf16, #tpu.memory_space<vmem>>, vector<8x64xbf16>
    %c0_184 = arith.constant 0 : index
    %c0_185 = arith.constant 0 : index
    %166 = vector.load %arg4[%c0_184, %c0_185] : memref<64x256xbf16, #tpu.memory_space<vmem>>, vector<64x256xbf16>
    %cst_186 = arith.constant dense<0.000000e+00> : vector<8x256xf32>
    %167 = tpu.matmul %165, %166, %cst_186 {dimension_numbers = #tpu.dot_dimension_numbers<[1], [0], [0], [1], [0, 0, 1, 1], [], []>} : vector<8x64xbf16>, vector<64x256xbf16>, vector<8x256xf32> -> vector<8x256xf32>
    %168 = arith.maximumf %164, %167 : vector<8x256xf32>
    %c0_187 = arith.constant 0 : index
    %c48_188 = arith.constant 48 : index
    %169 = vector.load %arg1[%c0_187, %c48_188] : memref<8x320xbf16, #tpu.memory_space<vmem>>, vector<8x64xbf16>
    %c0_189 = arith.constant 0 : index
    %c0_190 = arith.constant 0 : index
    %170 = vector.load %arg4[%c0_189, %c0_190] : memref<64x256xbf16, #tpu.memory_space<vmem>>, vector<64x256xbf16>
    %cst_191 = arith.constant dense<0.000000e+00> : vector<8x256xf32>
    %171 = tpu.matmul %169, %170, %cst_191 {dimension_numbers = #tpu.dot_dimension_numbers<[1], [0], [0], [1], [0, 0, 1, 1], [], []>} : vector<8x64xbf16>, vector<64x256xbf16>, vector<8x256xf32> -> vector<8x256xf32>
    %172 = arith.maximumf %168, %171 : vector<8x256xf32>
    %c0_192 = arith.constant 0 : index
    %c64_193 = arith.constant 64 : index
    %173 = vector.load %arg1[%c0_192, %c64_193] : memref<8x320xbf16, #tpu.memory_space<vmem>>, vector<8x64xbf16>
    %c0_194 = arith.constant 0 : index
    %c0_195 = arith.constant 0 : index
    %174 = vector.load %arg4[%c0_194, %c0_195] : memref<64x256xbf16, #tpu.memory_space<vmem>>, vector<64x256xbf16>
    %cst_196 = arith.constant dense<0.000000e+00> : vector<8x256xf32>
    %175 = tpu.matmul %173, %174, %cst_196 {dimension_numbers = #tpu.dot_dimension_numbers<[1], [0], [0], [1], [0, 0, 1, 1], [], []>} : vector<8x64xbf16>, vector<64x256xbf16>, vector<8x256xf32> -> vector<8x256xf32>
    %176 = arith.maximumf %172, %175 : vector<8x256xf32>
    %c0_197 = arith.constant 0 : index
    %c80_198 = arith.constant 80 : index
    %177 = vector.load %arg1[%c0_197, %c80_198] : memref<8x320xbf16, #tpu.memory_space<vmem>>, vector<8x64xbf16>
    %c0_199 = arith.constant 0 : index
    %c0_200 = arith.constant 0 : index
    %178 = vector.load %arg4[%c0_199, %c0_200] : memref<64x256xbf16, #tpu.memory_space<vmem>>, vector<64x256xbf16>
    %cst_201 = arith.constant dense<0.000000e+00> : vector<8x256xf32>
    %179 = tpu.matmul %177, %178, %cst_201 {dimension_numbers = #tpu.dot_dimension_numbers<[1], [0], [0], [1], [0, 0, 1, 1], [], []>} : vector<8x64xbf16>, vector<64x256xbf16>, vector<8x256xf32> -> vector<8x256xf32>
    %180 = arith.maximumf %176, %179 : vector<8x256xf32>
    %c0_202 = arith.constant 0 : index
    %c96_203 = arith.constant 96 : index
    %181 = vector.load %arg1[%c0_202, %c96_203] : memref<8x320xbf16, #tpu.memory_space<vmem>>, vector<8x64xbf16>
    %c0_204 = arith.constant 0 : index
    %c0_205 = arith.constant 0 : index
    %182 = vector.load %arg4[%c0_204, %c0_205] : memref<64x256xbf16, #tpu.memory_space<vmem>>, vector<64x256xbf16>
    %cst_206 = arith.constant dense<0.000000e+00> : vector<8x256xf32>
    %183 = tpu.matmul %181, %182, %cst_206 {dimension_numbers = #tpu.dot_dimension_numbers<[1], [0], [0], [1], [0, 0, 1, 1], [], []>} : vector<8x64xbf16>, vector<64x256xbf16>, vector<8x256xf32> -> vector<8x256xf32>
    %184 = arith.maximumf %180, %183 : vector<8x256xf32>
    %c0_207 = arith.constant 0 : index
    %c112_208 = arith.constant 112 : index
    %185 = vector.load %arg1[%c0_207, %c112_208] : memref<8x320xbf16, #tpu.memory_space<vmem>>, vector<8x64xbf16>
    %c0_209 = arith.constant 0 : index
    %c0_210 = arith.constant 0 : index
    %186 = vector.load %arg4[%c0_209, %c0_210] : memref<64x256xbf16, #tpu.memory_space<vmem>>, vector<64x256xbf16>
    %cst_211 = arith.constant dense<0.000000e+00> : vector<8x256xf32>
    %187 = tpu.matmul %185, %186, %cst_211 {dimension_numbers = #tpu.dot_dimension_numbers<[1], [0], [0], [1], [0, 0, 1, 1], [], []>} : vector<8x64xbf16>, vector<64x256xbf16>, vector<8x256xf32> -> vector<8x256xf32>
    %188 = arith.maximumf %184, %187 : vector<8x256xf32>
    %c0_212 = arith.constant 0 : index
    %c128_213 = arith.constant 128 : index
    %189 = vector.load %arg1[%c0_212, %c128_213] : memref<8x320xbf16, #tpu.memory_space<vmem>>, vector<8x64xbf16>
    %c0_214 = arith.constant 0 : index
    %c0_215 = arith.constant 0 : index
    %190 = vector.load %arg4[%c0_214, %c0_215] : memref<64x256xbf16, #tpu.memory_space<vmem>>, vector<64x256xbf16>
    %cst_216 = arith.constant dense<0.000000e+00> : vector<8x256xf32>
    %191 = tpu.matmul %189, %190, %cst_216 {dimension_numbers = #tpu.dot_dimension_numbers<[1], [0], [0], [1], [0, 0, 1, 1], [], []>} : vector<8x64xbf16>, vector<64x256xbf16>, vector<8x256xf32> -> vector<8x256xf32>
    %192 = arith.maximumf %188, %191 : vector<8x256xf32>
    %c0_217 = arith.constant 0 : index
    %c144_218 = arith.constant 144 : index
    %193 = vector.load %arg1[%c0_217, %c144_218] : memref<8x320xbf16, #tpu.memory_space<vmem>>, vector<8x64xbf16>
    %c0_219 = arith.constant 0 : index
    %c0_220 = arith.constant 0 : index
    %194 = vector.load %arg4[%c0_219, %c0_220] : memref<64x256xbf16, #tpu.memory_space<vmem>>, vector<64x256xbf16>
    %cst_221 = arith.constant dense<0.000000e+00> : vector<8x256xf32>
    %195 = tpu.matmul %193, %194, %cst_221 {dimension_numbers = #tpu.dot_dimension_numbers<[1], [0], [0], [1], [0, 0, 1, 1], [], []>} : vector<8x64xbf16>, vector<64x256xbf16>, vector<8x256xf32> -> vector<8x256xf32>
    %196 = arith.maximumf %192, %195 : vector<8x256xf32>
    %c0_222 = arith.constant 0 : index
    %c160_223 = arith.constant 160 : index
    %197 = vector.load %arg1[%c0_222, %c160_223] : memref<8x320xbf16, #tpu.memory_space<vmem>>, vector<8x64xbf16>
    %c0_224 = arith.constant 0 : index
    %c0_225 = arith.constant 0 : index
    %198 = vector.load %arg4[%c0_224, %c0_225] : memref<64x256xbf16, #tpu.memory_space<vmem>>, vector<64x256xbf16>
    %cst_226 = arith.constant dense<0.000000e+00> : vector<8x256xf32>
    %199 = tpu.matmul %197, %198, %cst_226 {dimension_numbers = #tpu.dot_dimension_numbers<[1], [0], [0], [1], [0, 0, 1, 1], [], []>} : vector<8x64xbf16>, vector<64x256xbf16>, vector<8x256xf32> -> vector<8x256xf32>
    %200 = arith.maximumf %196, %199 : vector<8x256xf32>
    %c0_227 = arith.constant 0 : index
    %c176_228 = arith.constant 176 : index
    %201 = vector.load %arg1[%c0_227, %c176_228] : memref<8x320xbf16, #tpu.memory_space<vmem>>, vector<8x64xbf16>
    %c0_229 = arith.constant 0 : index
    %c0_230 = arith.constant 0 : index
    %202 = vector.load %arg4[%c0_229, %c0_230] : memref<64x256xbf16, #tpu.memory_space<vmem>>, vector<64x256xbf16>
    %cst_231 = arith.constant dense<0.000000e+00> : vector<8x256xf32>
    %203 = tpu.matmul %201, %202, %cst_231 {dimension_numbers = #tpu.dot_dimension_numbers<[1], [0], [0], [1], [0, 0, 1, 1], [], []>} : vector<8x64xbf16>, vector<64x256xbf16>, vector<8x256xf32> -> vector<8x256xf32>
    %204 = arith.maximumf %200, %203 : vector<8x256xf32>
    %c0_232 = arith.constant 0 : index
    %c192_233 = arith.constant 192 : index
    %205 = vector.load %arg1[%c0_232, %c192_233] : memref<8x320xbf16, #tpu.memory_space<vmem>>, vector<8x64xbf16>
    %c0_234 = arith.constant 0 : index
    %c0_235 = arith.constant 0 : index
    %206 = vector.load %arg4[%c0_234, %c0_235] : memref<64x256xbf16, #tpu.memory_space<vmem>>, vector<64x256xbf16>
    %cst_236 = arith.constant dense<0.000000e+00> : vector<8x256xf32>
    %207 = tpu.matmul %205, %206, %cst_236 {dimension_numbers = #tpu.dot_dimension_numbers<[1], [0], [0], [1], [0, 0, 1, 1], [], []>} : vector<8x64xbf16>, vector<64x256xbf16>, vector<8x256xf32> -> vector<8x256xf32>
    %208 = arith.maximumf %204, %207 : vector<8x256xf32>
    %c0_237 = arith.constant 0 : index
    %c208_238 = arith.constant 208 : index
    %209 = vector.load %arg1[%c0_237, %c208_238] : memref<8x320xbf16, #tpu.memory_space<vmem>>, vector<8x64xbf16>
    %c0_239 = arith.constant 0 : index
    %c0_240 = arith.constant 0 : index
    %210 = vector.load %arg4[%c0_239, %c0_240] : memref<64x256xbf16, #tpu.memory_space<vmem>>, vector<64x256xbf16>
    %cst_241 = arith.constant dense<0.000000e+00> : vector<8x256xf32>
    %211 = tpu.matmul %209, %210, %cst_241 {dimension_numbers = #tpu.dot_dimension_numbers<[1], [0], [0], [1], [0, 0, 1, 1], [], []>} : vector<8x64xbf16>, vector<64x256xbf16>, vector<8x256xf32> -> vector<8x256xf32>
    %212 = arith.maximumf %208, %211 : vector<8x256xf32>
    %c0_242 = arith.constant 0 : index
    %c224_243 = arith.constant 224 : index
    %213 = vector.load %arg1[%c0_242, %c224_243] : memref<8x320xbf16, #tpu.memory_space<vmem>>, vector<8x64xbf16>
    %c0_244 = arith.constant 0 : index
    %c0_245 = arith.constant 0 : index
    %214 = vector.load %arg4[%c0_244, %c0_245] : memref<64x256xbf16, #tpu.memory_space<vmem>>, vector<64x256xbf16>
    %cst_246 = arith.constant dense<0.000000e+00> : vector<8x256xf32>
    %215 = tpu.matmul %213, %214, %cst_246 {dimension_numbers = #tpu.dot_dimension_numbers<[1], [0], [0], [1], [0, 0, 1, 1], [], []>} : vector<8x64xbf16>, vector<64x256xbf16>, vector<8x256xf32> -> vector<8x256xf32>
    %216 = arith.maximumf %212, %215 : vector<8x256xf32>
    %c0_247 = arith.constant 0 : index
    %c240_248 = arith.constant 240 : index
    %217 = vector.load %arg1[%c0_247, %c240_248] : memref<8x320xbf16, #tpu.memory_space<vmem>>, vector<8x64xbf16>
    %c0_249 = arith.constant 0 : index
    %c0_250 = arith.constant 0 : index
    %218 = vector.load %arg4[%c0_249, %c0_250] : memref<64x256xbf16, #tpu.memory_space<vmem>>, vector<64x256xbf16>
    %cst_251 = arith.constant dense<0.000000e+00> : vector<8x256xf32>
    %219 = tpu.matmul %217, %218, %cst_251 {dimension_numbers = #tpu.dot_dimension_numbers<[1], [0], [0], [1], [0, 0, 1, 1], [], []>} : vector<8x64xbf16>, vector<64x256xbf16>, vector<8x256xf32> -> vector<8x256xf32>
    %220 = arith.maximumf %216, %219 : vector<8x256xf32>
    %c0_252 = arith.constant 0 : index
    %c256_253 = arith.constant 256 : index
    %221 = vector.load %arg1[%c0_252, %c256_253] : memref<8x320xbf16, #tpu.memory_space<vmem>>, vector<8x64xbf16>
    %c0_254 = arith.constant 0 : index
    %c0_255 = arith.constant 0 : index
    %222 = vector.load %arg4[%c0_254, %c0_255] : memref<64x256xbf16, #tpu.memory_space<vmem>>, vector<64x256xbf16>
    %cst_256 = arith.constant dense<0.000000e+00> : vector<8x256xf32>
    %223 = tpu.matmul %221, %222, %cst_256 {dimension_numbers = #tpu.dot_dimension_numbers<[1], [0], [0], [1], [0, 0, 1, 1], [], []>} : vector<8x64xbf16>, vector<64x256xbf16>, vector<8x256xf32> -> vector<8x256xf32>
    %224 = arith.maximumf %220, %223 : vector<8x256xf32>
    %c2 = arith.constant 2 : index
    %c0_257 = arith.constant 0 : index
    %c0_258 = arith.constant 0 : index
    %225 = vector.load %arg5[%c2, %c0_257, %c0_258] : memref<3x1x256xf32, #tpu.memory_space<vmem>>, vector<1x1x256xf32>
    %226 = vector.shape_cast %225 : vector<1x1x256xf32> to vector<1x256xf32>
    %227 = vector.broadcast %226 : vector<1x256xf32> to vector<8x256xf32>
    %228 = arith.addf %224, %227 : vector<8x256xf32>
    %cst_259 = arith.constant 0.000000e+00 : f32
    %229 = vector.broadcast %cst_259 : f32 to vector<8x256xf32>
    %230 = arith.maximumf %228, %229 : vector<8x256xf32>
    %231 = arith.truncf %80 : vector<8x256xf32> to vector<8x256xbf16>
    %c0_260 = arith.constant 0 : index
    %c0_261 = arith.constant 0 : index
    %c0_262 = arith.constant 0 : index
    %232 = vector.load %arg6[%c0_260, %c0_261, %c0_262] : memref<3x256x128xbf16, #tpu.memory_space<vmem>>, vector<1x256x128xbf16>
    %233 = vector.shape_cast %232 : vector<1x256x128xbf16> to vector<256x128xbf16>
    %cst_263 = arith.constant dense<0.000000e+00> : vector<8x128xf32>
    %234 = tpu.matmul %231, %233, %cst_263 {dimension_numbers = #tpu.dot_dimension_numbers<[1], [0], [0], [1], [0, 0, 1, 1], [], []>} : vector<8x256xbf16>, vector<256x128xbf16>, vector<8x128xf32> -> vector<8x128xf32>
    %235 = arith.truncf %157 : vector<8x256xf32> to vector<8x256xbf16>
    %c1_264 = arith.constant 1 : index
    %c0_265 = arith.constant 0 : index
    %c0_266 = arith.constant 0 : index
    %236 = vector.load %arg6[%c1_264, %c0_265, %c0_266] : memref<3x256x128xbf16, #tpu.memory_space<vmem>>, vector<1x256x128xbf16>
    %237 = vector.shape_cast %236 : vector<1x256x128xbf16> to vector<256x128xbf16>
    %cst_267 = arith.constant dense<0.000000e+00> : vector<8x128xf32>
    %238 = tpu.matmul %235, %237, %cst_267 {dimension_numbers = #tpu.dot_dimension_numbers<[1], [0], [0], [1], [0, 0, 1, 1], [], []>} : vector<8x256xbf16>, vector<256x128xbf16>, vector<8x128xf32> -> vector<8x128xf32>
    %239 = arith.addf %234, %238 : vector<8x128xf32>
    %240 = arith.truncf %230 : vector<8x256xf32> to vector<8x256xbf16>
    %c2_268 = arith.constant 2 : index
    %c0_269 = arith.constant 0 : index
    %c0_270 = arith.constant 0 : index
    %241 = vector.load %arg6[%c2_268, %c0_269, %c0_270] : memref<3x256x128xbf16, #tpu.memory_space<vmem>>, vector<1x256x128xbf16>
    %242 = vector.shape_cast %241 : vector<1x256x128xbf16> to vector<256x128xbf16>
    %cst_271 = arith.constant dense<0.000000e+00> : vector<8x128xf32>
    %243 = tpu.matmul %240, %242, %cst_271 {dimension_numbers = #tpu.dot_dimension_numbers<[1], [0], [0], [1], [0, 0, 1, 1], [], []>} : vector<8x256xbf16>, vector<256x128xbf16>, vector<8x128xf32> -> vector<8x128xf32>
    %244 = arith.addf %239, %243 : vector<8x128xf32>
    %c0_272 = arith.constant 0 : index
    %c0_273 = arith.constant 0 : index
    %245 = vector.load %arg7[%c0_272, %c0_273] : memref<1x128xf32, #tpu.memory_space<vmem>>, vector<1x128xf32>
    %246 = vector.broadcast %245 : vector<1x128xf32> to vector<8x128xf32>
    %247 = arith.addf %244, %246 : vector<8x128xf32>
    %cst_274 = arith.constant 0.000000e+00 : f32
    %248 = vector.broadcast %cst_274 : f32 to vector<8x128xf32>
    %249 = arith.maximumf %247, %248 : vector<8x128xf32>
    %250 = arith.truncf %249 : vector<8x128xf32> to vector<8x128xbf16>
    %c0_275 = arith.constant 0 : index
    %c0_276 = arith.constant 0 : index
    %251 = vector.load %arg8[%c0_275, %c0_276] : memref<128x4xbf16, #tpu.memory_space<vmem>>, vector<128x4xbf16>
    %cst_277 = arith.constant dense<0.000000e+00> : vector<8x4xf32>
    %252 = tpu.matmul %250, %251, %cst_277 {dimension_numbers = #tpu.dot_dimension_numbers<[1], [0], [0], [1], [0, 0, 1, 1], [], []>} : vector<8x128xbf16>, vector<128x4xbf16>, vector<8x4xf32> -> vector<8x4xf32>
    %c0_278 = arith.constant 0 : index
    %c0_279 = arith.constant 0 : index
    %253 = vector.load %arg9[%c0_278, %c0_279] : memref<1x4xf32, #tpu.memory_space<vmem>>, vector<1x4xf32>
    %254 = vector.broadcast %253 : vector<1x4xf32> to vector<8x4xf32>
    %255 = arith.addf %252, %254 : vector<8x4xf32>
    %c0_280 = arith.constant 0 : index
    %c0_281 = arith.constant 0 : index
    %256 = vector.load %arg10[%c0_280, %c0_281] : memref<8x4xf32, #tpu.memory_space<vmem>>, vector<8x4xf32>
    tpu.vector_store %arg10[%c0_280, %c0_281], %255 {strides = array<i32>} : memref<8x4xf32, #tpu.memory_space<vmem>>, vector<8x4xf32>,
    return
  }
  func.func @transform_0(%arg0: i32) -> (i32, i32) {
    %c0_i32 = arith.constant 0 : i32
    %c0_i32_0 = arith.constant 0 : i32
    return %arg0, %c0_i32 : i32, i32
  }
  func.func @transform_1(%arg0: i32) -> (i32, i32) {
    %c0_i32 = arith.constant 0 : i32
    %c0_i32_0 = arith.constant 0 : i32
    %c0_i32_1 = arith.constant 0 : i32
    return %c0_i32, %c0_i32_0 : i32, i32
  }
  func.func @transform_2(%arg0: i32) -> (i32, i32) {
    %c0_i32 = arith.constant 0 : i32
    %c0_i32_0 = arith.constant 0 : i32
    %c0_i32_1 = arith.constant 0 : i32
    return %c0_i32, %c0_i32_0 : i32, i32
  }
  func.func @transform_3(%arg0: i32) -> (i32, i32) {
    %c0_i32 = arith.constant 0 : i32
    %c0_i32_0 = arith.constant 0 : i32
    %c0_i32_1 = arith.constant 0 : i32
    return %c0_i32, %c0_i32_0 : i32, i32
  }
  func.func @transform_4(%arg0: i32) -> (i32, i32, i32) {
    %c0_i32 = arith.constant 0 : i32
    %c0_i32_0 = arith.constant 0 : i32
    %c0_i32_1 = arith.constant 0 : i32
    %c0_i32_2 = arith.constant 0 : i32
    return %c0_i32, %c0_i32_0, %c0_i32_1 : i32, i32, i32
  }
  func.func @transform_5(%arg0: i32) -> (i32, i32, i32) {
    %c0_i32 = arith.constant 0 : i32
    %c0_i32_0 = arith.constant 0 : i32
    %c0_i32_1 = arith.constant 0 : i32
    %c0_i32_2 = arith.constant 0 : i32
    return %c0_i32, %c0_i32_0, %c0_i32_1 : i32, i32, i32
  }
  func.func @transform_6(%arg0: i32) -> (i32, i32) {
    %c0_i32 = arith.constant 0 : i32
    %c0_i32_0 = arith.constant 0 : i32
    %c0_i32_1 = arith.constant 0 : i32
    return %c0_i32, %c0_i32_0 : i32, i32
  }
  func.func @transform_7(%arg0: i32) -> (i32, i32) {
    %c0_i32 = arith.constant 0 : i32
    %c0_i32_0 = arith.constant 0 : i32
    %c0_i32_1 = arith.constant 0 : i32
    return %c0_i32, %c0_i32_0 : i32, i32
  }
  func.func @transform_8(%arg0: i32) -> (i32, i32) {
    %c0_i32 = arith.constant 0 : i32
    %c0_i32_0 = arith.constant 0 : i32
    %c0_i32_1 = arith.constant 0 : i32
    return %c0_i32, %c0_i32_0 : i32, i32
  }
  func.func @transform_9(%arg0: i32) -> (i32, i32) {
    %c0_i32 = arith.constant 0 : i32
    %c0_i32_0 = arith.constant 0 : i32
    return %arg0, %c0_i32 : i32, i32
  }
}

</mosaic_0001>

<bundles_post_ra>
// kernel: textcnn_forward.1
= control target key start
LH: loop header
LB: loop body
LE: loop exit
PB: predicated region body
PF: predicated region fallthrough
CT: control target
= control target key end

     0   :  { %14 = vsyncpa [#allocation3], 0  ;;  %s3000_s12 = smov [#allocation2]   ;;  %s3001_s14 = smov 64   ;;  %s3949_s0 = inlined_call_operand.vmem [shape: bf16[8,320], index: 0, kind: input, shape index: {}]   ;;  %s3950_s1 = inlined_call_operand.vmem [shape: bf16[32,256], index: 1, kind: input, shape index: {}]   ;;  %s3951_s2 = inlined_call_operand.vmem [shape: bf16[48,256], index: 2, kind: input, shape index: {}]   ;;  %s3952_s3 = inlined_call_operand.vmem [shape: bf16[64,256], index: 3, kind: input, shape index: {}]   ;;  %s3953_s4 = inlined_call_operand.vmem [shape: f32[3,1,256], index: 4, kind: input, shape index: {}]   ;;  %s3954_s5 = inlined_call_operand.hbm [shape: bf16[3,256,128], index: 5, kind: input, shape index: {}]   ;;  %s3955_s6 = inlined_call_operand.vmem [shape: f32[1,128], index: 6, kind: input, shape index: {}]   ;;  %s3956_s7 = inlined_call_operand.vmem [shape: bf16[128,4], index: 7, kind: input, shape index: {}]   ;;  %s3957_s8 = inlined_call_operand.vmem [shape: f32[1,4], index: 8, kind: input, shape index: {}]   ;;  %s3958_s9 = inlined_call_operand.vmem [shape: f32[8,4], index: 9, kind: output, shape index: {}]  }
   0x1   :  { %s29_s11 = sshll.u32 %s3954_s5, 4  ;;  %s31_s13 = sshll.u32 %s3000_s12, 4  ;;  %s30_s11 = int_to_ptr.hbm [resolvable:$true] %s29_s11  ;;  %s32_s13 = int_to_ptr.vmem [resolvable:$true] %s31_s13 }
   0x2   :  { %s3002_s15 = smov 4  }
   0x3   :  { %37 = dma.hbm_to_vmem [thread:$0]  %s30_s11, 6144, %s32_s13, [#allocation3], %s3001_s14, %s3001_s14, %s3002_s15  }
   0x4   :  { %2998 = dma.done.wait [#allocation3], 6144  }
   0x5   :  { %2999 = vsyncadd [#allocation3], 4294961152  ;;  %v3067_v0 = vld [vmem:[%s3949_s0] sm:$0xf]  ;;  %s3003_s19 = smov 96   ;;  %s3004_s20 = smov 112  }
   0x6   :  { %v105_v1 = vunpack.c.l.b16 %v3067_v0  ;;  %v305_v3 = vld [vmem:[%s3949_s0] sm:$0xff]  ;;  %v2490_v4 = vld [vmem:[%s3950_s1 + $0x10] sm:$0xf]  ;;  %v2889_v5 = vld [vmem:[%s3950_s1 + $0x14] sm:$0xf0]  ;;  %vm74_vm0 = vcmask 261120  }
   0x7   :  { %v307_v6 = vunpack.c.l.b16 %v305_v3  ;;  %v3082_v7 = vor.u32 %v2889_v5, %v2490_v4  ;;  %v2482_v8 = vld [vmem:[%s3950_s1] sm:$0xf]  ;;  %v2887_v9 = vld [vmem:[%s3950_s1 + $0x4] sm:$0xf0]  ;;  %v2888_v10 = vld [vmem:[%s3950_s1 + $0x14] sm:$0xf]  ;;  %v308_v18 = vunpack.c.h.b16 %v305_v3 }
   0x8   :  { %v106_v2 = vpack.c.b16 %v105_v1, %v105_v1  ;;  %v2492_v11 = vld [vmem:[%s3950_s1 + $0x18] sm:$0xf0]  ;;  %v2886_v12 = vld [vmem:[%s3950_s1 + $0x4] sm:$0xf]  ;;  %v2484_v13 = vld [vmem:[%s3950_s1 + $0x8] sm:$0xf0]  ;;  %v3103_v14 = vor.u32 %v2887_v9, %v2482_v8 }
   0x9   :  { %84 = vmatpush.bf16.msra.mxu3 %v3082_v7  ;;  %v3105_v15 = vor.u32 %v2888_v10, %v2492_v11  ;;  %118 = vmatpush.bf16.msra.mxu2 %v3082_v7  ;;  %v309_v16 = vpack.c.b16 %v307_v6, %v307_v6  ;;  %v3110_v17 = vor.u32 %v2886_v12, %v2484_v13  ;;  %s3005_s1 = smov 80   ;;  %s3006_s17 = smov 48   ;;  %v3119_v19 = vld [vmem:[%s3949_s0 + $0x4] sm:$0xf]  ;;  %v3157_v26 = vld [vmem:[%s3949_s0 + $0x8] sm:$0xf] }
   0xa   :  { %140 = vrot.lane.b32.xlu1 %v106_v2, %s3003_s19  ;;  %107 = vrot.lane.b32.xlu0 %v106_v2, %s3004_s20  ;;  %s3007_s21 = smov 16   ;;  %v381_v20 = vunpack.c.l.b16 %v3119_v19  ;;  %v310_v21 = vpack.c.b16 %v308_v18, %v308_v18  ;;  %s3008_s22 = smov 32   ;;  %v581_v23 = vld [vmem:[%s3949_s0 + $0x4] sm:$0xff]  ;;  %v656_v27 = vunpack.c.l.b16 %v3157_v26  ;;  %vm315_vm1 = vcmask 130048   ;;  %v2552_v52 = vld [vmem:[%s3951_s2 + $0x20] sm:$0xf] }
   0xb   :  { %206 = vrot.lane.b32.xlu2 %v106_v2, %s3001_s14  ;;  %151 = vmatpush.bf16.msra.mxu0 %v3082_v7  ;;  %v583_v24 = vunpack.c.l.b16 %v581_v23  ;;  %v584_v29 = vunpack.c.h.b16 %v581_v23  ;;  %v2895_v53 = vld [vmem:[%s3951_s2 + $0x24] sm:$0xf0]  ;;  %v2894_v54 = vld [vmem:[%s3951_s2 + $0x24] sm:$0xf]  ;;  %v2554_v55 = vld [vmem:[%s3951_s2 + $0x28] sm:$0xf0] }
   0xc   :  { %97 = vmatpush.bf16.msra.mxu1 %v3105_v15  ;;  %v382_v22 = vpack.c.b16 %v381_v20, %v381_v20  ;;  %v657_v28 = vpack.c.b16 %v656_v27, %v656_v27  ;;  %v3320_v57 = vor.u32 %v2895_v53, %v2552_v52  ;;  %v3322_v58 = vor.u32 %v2894_v54, %v2554_v55  ;;  %v2544_v59 = vld [vmem:[%s3951_s2 + $0x10] sm:$0xf]  ;;  %v2893_v60 = vld [vmem:[%s3951_s2 + $0x14] sm:$0xf0]  ;;  %v2892_v61 = vld [vmem:[%s3951_s2 + $0x14] sm:$0xf] }
   0xd   :  { %85 = vmatpush.bf16.msra.mxu3 %v3103_v14  ;;  %119 = vmatpush.bf16.msra.mxu2 %v3103_v14  ;;  %v585_v25 = vpack.c.b16 %v583_v24, %v583_v24  ;;  %v586_v30 = vpack.c.b16 %v584_v29, %v584_v29  ;;  %v2546_v62 = vld [vmem:[%s3951_s2 + $0x18] sm:$0xf0]  ;;  %v3346_v63 = vor.u32 %v2893_v60, %v2544_v59  ;;  %v2891_v3 = vld [vmem:[%s3951_s2 + $0x4] sm:$0xf0]  ;;  %v2890_v4 = vld [vmem:[%s3951_s2 + $0x4] sm:$0xf] }
   0xe   :  { %v3348_v1 = vor.u32 %v2892_v61, %v2546_v62  ;;  %v2538_v5 = vld [vmem:[%s3951_s2 + $0x8] sm:$0xf0]  ;;  %vm770_vm2 = vcmask 392192   ;;  %vm1381_vm3 = vcmask 523264   ;;  %vm2473_vm4 = vcmask 31744  }
   0xf   :  { %152 = vmatpush.bf16.msra.mxu0 %v3103_v14 }
  0x10   :  { %98 = vmatpush.bf16.msra.mxu1 %v3110_v17  ;;  %2496 = vmatmul.msk.bf16.vlgmr.msra.gmra.mxu3 %vm74_vm0, %v3067_v0 }
  0x11   :  { %131 = vmatpush.bf16.msrb.mxu3 %v3105_v15  ;;  %184 = vmatpush.bf16.msrb.mxu2 %v3082_v7 }
  0x12   :  { %173 = vrot.lane.b32.xlu0 %v106_v2, %s3005_s1  ;;  %239 = vrot.lane.b32.xlu1 %v106_v2, %s3006_s17 }
  0x13   :  { %311 = vrot.lane.b32.xlu2 %v309_v16, %s3007_s21  ;;  %2497 = vmatmul.msk.bf16.vlgmr.msra.gmra.mxu1 %vm74_vm0, %v3067_v0 }
  0x14   :  { %164 = vmatpush.bf16.msrb.mxu1 %v3105_v15  ;;  %217 = vmatpush.bf16.msrb.mxu0 %v3082_v7 }
  0x15   :  { %132 = vmatpush.bf16.msrb.mxu3 %v3110_v17  ;;  %185 = vmatpush.bf16.msrb.mxu2 %v3103_v14 }
  0x18   :  { %165 = vmatpush.bf16.msrb.mxu1 %v3110_v17  ;;  %218 = vmatpush.bf16.msrb.mxu0 %v3103_v14 }
  0x19   :  { %197 = vmatpush.bf16.msra.mxu3 %v3105_v15 }
  0x1a   :  { %272 = vrot.lane.b32.xlu1 %v106_v2, %s3008_s22  ;;  %313 = vrot.lane.b32.xlu0 %v310_v21, %s3007_s21  ;;  %v2536_v2 = vld [vmem:[%s3951_s2] sm:$0xf] }
  0x1b   :  { %383 = vrot.lane.b32.xlu2 %v382_v22, %s3004_s20  ;;  %v3366_v6 = vor.u32 %v2891_v3, %v2536_v2 }
  0x1c   :  { %230 = vmatpush.bf16.msra.mxu1 %v3105_v15 }
  0x1d   :  { %198 = vmatpush.bf16.msra.mxu3 %v3110_v17 }
  0x20   :  { %231 = vmatpush.bf16.msra.mxu1 %v3110_v17 }
  0x22   :  { %416 = vrot.lane.b32.xlu1 %v382_v22, %s3003_s19  ;;  %449 = vrot.lane.b32.xlu0 %v382_v22, %s3005_s1 }
  0x23   :  { %515 = vrot.lane.b32.xlu2 %v382_v22, %s3006_s17 }
  0x2a   :  { %482 = vrot.lane.b32.xlu0 %v382_v22, %s3001_s14  ;;  %587 = vrot.lane.b32.xlu1 %v585_v25, %s3007_s21 }
  0x2b   :  { %589 = vrot.lane.b32.xlu2 %v586_v30, %s3007_s21 }
  0x32   :  { %548 = vrot.lane.b32.xlu0 %v382_v22, %s3008_s22  ;;  %658 = vrot.lane.b32.xlu1 %v657_v28, %s3004_s20 }
  0x33   :  { %691 = vrot.lane.b32.xlu2 %v657_v28, %s3003_s19 }
  0x3a   :  { %949 = vrot.lane.b32.xlu0 %v309_v16, %s3008_s22  ;;  %951 = vrot.lane.b32.xlu1 %v310_v21, %s3008_s22 }
  0x3b   :  { %1196 = vrot.lane.b32.xlu2 %v585_v25, %s3008_s22 }
  0x42   :  { %1198 = vrot.lane.b32.xlu0 %v586_v30, %s3008_s22  ;;  %1530 = vrot.lane.b32.xlu1 %v309_v16, %s3006_s17 }
  0x43   :  { %1532 = vrot.lane.b32.xlu2 %v310_v21, %s3006_s17 }
  0x4a   :  { %1777 = vrot.lane.b32.xlu0 %v585_v25, %s3006_s17  ;;  %1779 = vrot.lane.b32.xlu1 %v586_v30, %s3006_s17 }
  0x65   :  { %v3192_v34 = vpop.permute.xlu2 %206 }
  0x6d   :  { %v312_v37 = vpop.permute.xlu2 %311 }
  0x75   :  { %v3245_v40 = vpop.permute.xlu2 %383 }
  0x7c   :  { %v3168_v31 = vpop.permute.xlu1 %140  ;;  %v3170_v32 = vpop.permute.xlu0 %107 }
  0x7d   :  { %2498 = vmatmul.msk.bf16.vlgmr.msra.gmra.mxu2 %vm74_vm0, %v3170_v32  ;;  %2499 = vmatmul.msk.bf16.vlgmr.msrb.gmra.mxu3 %vm74_vm0, %v3170_v32  ;;  %v3289_v48 = vpop.permute.xlu2 %515 }
  0x7e   :  { %2500 = vmatmul.msk.bf16.vlgmr.msra.gmra.mxu0 %vm74_vm0, %v3168_v31  ;;  %2501 = vmatmul.msk.bf16.vlgmr.msrb.gmra.mxu1 %vm74_vm0, %v3168_v31 }
  0x7f   :  { %250 = vmatpush.bf16.msra.mxu2 %v3082_v7  ;;  %263 = vmatpush.bf16.msrb.mxu3 %v3105_v15 }
  0x80   :  { %283 = vmatpush.bf16.msra.mxu0 %v3082_v7  ;;  %296 = vmatpush.bf16.msrb.mxu1 %v3105_v15 }
  0x83   :  { %251 = vmatpush.bf16.msra.mxu2 %v3103_v14  ;;  %264 = vmatpush.bf16.msrb.mxu3 %v3110_v17 }
  0x84   :  { %284 = vmatpush.bf16.msra.mxu0 %v3103_v14  ;;  %297 = vmatpush.bf16.msrb.mxu1 %v3110_v17  ;;  %v3189_v33 = vpop.permute.xlu0 %173  ;;  %v3206_v35 = vpop.permute.xlu1 %239 }
  0x85   :  { %v590_v50 = vpop.permute.xlu2 %589 }
  0x8c   :  { %v273_v36 = vpop.permute.xlu1 %272  ;;  %v314_v38 = vpop.permute.xlu0 %313 }
  0x8d   :  { %2502 = vmatmul.msk.bf16.vlgmr.msrb.gmra.mxu2 %vm74_vm0, %v3189_v33  ;;  %2503 = vmatmul.msk.bf16.vlgmr.msra.gmra.mxu3 %vm74_vm0, %v3189_v33  ;;  %v3227_v39 = vsel %vm315_vm1, %v312_v37, %v314_v38  ;;  %v692_v8 = vpop.permute.xlu2 %691 }
  0x8e   :  { %2504 = vmatmul.msk.bf16.vlgmr.msrb.gmra.mxu0 %vm74_vm0, %v3192_v34  ;;  %2505 = vmatmul.msk.bf16.vlgmr.msra.gmra.mxu1 %vm74_vm0, %v3192_v34 }
  0x8f   :  { %326 = vmatpush.bf16.msrb.mxu2 %v3082_v7  ;;  %339 = vmatpush.bf16.msra.mxu3 %v3105_v15 }
  0x90   :  { %358 = vmatpush.bf16.msrb.mxu0 %v3082_v7  ;;  %371 = vmatpush.bf16.msra.mxu1 %v3105_v15  ;;  %v3259_v43 = vpop.f32.mrf.mxu1 }
  0x93   :  { %327 = vmatpush.bf16.msrb.mxu2 %v3103_v14  ;;  %340 = vmatpush.bf16.msra.mxu3 %v3110_v17  ;;  %v3257_v42 = vpop.f32.mrf.mxu3 }
  0x94   :  { %359 = vmatpush.bf16.msrb.mxu0 %v3103_v14  ;;  %372 = vmatpush.bf16.msra.mxu1 %v3110_v17  ;;  %v3247_v41 = vpop.permute.xlu1 %416  ;;  %v3265_v44 = vpop.permute.xlu0 %449 }
  0x98   :  { %v102_v46 = vpop.f32.mrf.mxu1 }
  0x9b   :  { %v89_v45 = vpop.f32.mrf.mxu3 }
  0x9c   :  { %v3271_v47 = vpop.permute.xlu0 %482  ;;  %v588_v51 = vpop.permute.xlu1 %587 }
  0x9d   :  { %2506 = vmatmul.msk.bf16.vlgmr.msra.gmra.mxu2 %vm74_vm0, %v3206_v35  ;;  %2507 = vmatmul.msk.bf16.vlgmr.msrb.gmra.mxu3 %vm74_vm0, %v3206_v35  ;;  %v3318_v56 = vsel %vm315_vm1, %v588_v51, %v590_v50 }
  0x9e   :  { %2508 = vmatmul.msk.bf16.vlgmr.msra.gmra.mxu0 %vm74_vm0, %v273_v36  ;;  %2509 = vmatmul.msk.bf16.vlgmr.msrb.gmra.mxu1 %vm74_vm0, %v273_v36 }
  0x9f   :  { %394 = vmatpush.bf16.msra.mxu2 %v3082_v7  ;;  %407 = vmatpush.bf16.msrb.mxu3 %v3105_v15 }
  0xa0   :  { %427 = vmatpush.bf16.msra.mxu0 %v3082_v7  ;;  %440 = vmatpush.bf16.msrb.mxu1 %v3105_v15 }
  0xa3   :  { %395 = vmatpush.bf16.msra.mxu2 %v3103_v14  ;;  %408 = vmatpush.bf16.msrb.mxu3 %v3110_v17 }
  0xa4   :  { %428 = vmatpush.bf16.msra.mxu0 %v3103_v14  ;;  %441 = vmatpush.bf16.msrb.mxu1 %v3110_v17  ;;  %v549_v49 = vpop.permute.xlu0 %548  ;;  %v3376_v9 = vpop.permute.xlu1 %658 }
  0xad   :  { %2510 = vmatmul.msk.bf16.vlgmr.msrb.gmra.mxu2 %vm74_vm0, %v3227_v39  ;;  %2511 = vmatmul.msk.bf16.vlgmr.msra.gmra.mxu3 %vm74_vm0, %v3227_v39 }
  0xae   :  { %2512 = vmatmul.msk.bf16.vlgmr.msrb.gmra.mxu0 %vm74_vm0, %v3119_v19  ;;  %2513 = vmatmul.msk.bf16.vlgmr.msra.gmra.mxu1 %vm74_vm0, %v3119_v19 }
  0xaf   :  { %460 = vmatpush.bf16.msrb.mxu2 %v3082_v7  ;;  %473 = vmatpush.bf16.msra.mxu3 %v3105_v15 }
  0xb0   :  { %493 = vmatpush.bf16.msrb.mxu0 %v3082_v7  ;;  %506 = vmatpush.bf16.msra.mxu1 %v3105_v15 }
  0xb3   :  { %461 = vmatpush.bf16.msrb.mxu2 %v3103_v14  ;;  %474 = vmatpush.bf16.msra.mxu3 %v3110_v17 }
  0xb4   :  { %494 = vmatpush.bf16.msrb.mxu0 %v3103_v14  ;;  %507 = vmatpush.bf16.msra.mxu1 %v3110_v17 }
  0xbd   :  { %2514 = vmatmul.msk.bf16.vlgmr.msra.gmra.mxu2 %vm74_vm0, %v3245_v40  ;;  %2515 = vmatmul.msk.bf16.vlgmr.msrb.gmra.mxu3 %vm74_vm0, %v3245_v40 }
  0xbe   :  { %2516 = vmatmul.msk.bf16.vlgmr.msra.gmra.mxu0 %vm74_vm0, %v3247_v41  ;;  %2517 = vmatmul.msk.bf16.vlgmr.msrb.gmra.mxu1 %vm74_vm0, %v3247_v41 }
  0xbf   :  { %526 = vmatpush.bf16.msra.mxu2 %v3082_v7  ;;  %539 = vmatpush.bf16.msrb.mxu3 %v3105_v15 }
  0xc0   :  { %559 = vmatpush.bf16.msra.mxu0 %v3082_v7  ;;  %572 = vmatpush.bf16.msrb.mxu1 %v3105_v15 }
  0xc3   :  { %527 = vmatpush.bf16.msra.mxu2 %v3103_v14  ;;  %540 = vmatpush.bf16.msrb.mxu3 %v3110_v17 }
  0xc4   :  { %560 = vmatpush.bf16.msra.mxu0 %v3103_v14  ;;  %573 = vmatpush.bf16.msrb.mxu1 %v3110_v17 }
  0xcd   :  { %2518 = vmatmul.msk.bf16.vlgmr.msrb.gmra.mxu2 %vm74_vm0, %v3265_v44  ;;  %2519 = vmatmul.msk.bf16.vlgmr.msra.gmra.mxu3 %vm74_vm0, %v3265_v44 }
  0xce   :  { %2520 = vmatmul.msk.bf16.vlgmr.msrb.gmra.mxu0 %vm74_vm0, %v3271_v47  ;;  %2521 = vmatmul.msk.bf16.vlgmr.msra.gmra.mxu1 %vm74_vm0, %v3271_v47 }
  0xcf   :  { %601 = vmatpush.bf16.msrb.mxu2 %v3082_v7  ;;  %614 = vmatpush.bf16.msra.mxu3 %v3105_v15 }
  0xd0   :  { %633 = vmatpush.bf16.msrb.mxu0 %v3082_v7  ;;  %646 = vmatpush.bf16.msra.mxu1 %v3105_v15 }
  0xd3   :  { %602 = vmatpush.bf16.msrb.mxu2 %v3103_v14  ;;  %615 = vmatpush.bf16.msra.mxu3 %v3110_v17 }
  0xd4   :  { %634 = vmatpush.bf16.msrb.mxu0 %v3103_v14  ;;  %647 = vmatpush.bf16.msra.mxu1 %v3110_v17 }
  0xdd   :  { %2522 = vmatmul.msk.bf16.vlgmr.msra.gmra.mxu2 %vm74_vm0, %v3289_v48  ;;  %2523 = vmatmul.msk.bf16.vlgmr.msrb.gmra.mxu3 %vm74_vm0, %v3289_v48 }
  0xde   :  { %2524 = vmatmul.msk.bf16.vlgmr.msra.gmra.mxu0 %vm74_vm0, %v549_v49  ;;  %2525 = vmatmul.msk.bf16.vlgmr.msrb.gmra.mxu1 %vm74_vm0, %v549_v49 }
  0xdf   :  { %669 = vmatpush.bf16.msra.mxu2 %v3082_v7  ;;  %682 = vmatpush.bf16.msrb.mxu3 %v3105_v15 }
  0xe0   :  { %702 = vmatpush.bf16.msra.mxu0 %v3082_v7  ;;  %715 = vmatpush.bf16.msrb.mxu1 %v3105_v15  ;;  %v3368_v7 = vor.u32 %v2890_v4, %v2538_v5 }
  0xe3   :  { %670 = vmatpush.bf16.msra.mxu2 %v3103_v14  ;;  %683 = vmatpush.bf16.msrb.mxu3 %v3110_v17 }
  0xe4   :  { %703 = vmatpush.bf16.msra.mxu0 %v3103_v14  ;;  %716 = vmatpush.bf16.msrb.mxu1 %v3110_v17 }
  0xed   :  { %2526 = vmatmul.msk.bf16.vlgmr.msrb.gmra.mxu2 %vm74_vm0, %v3318_v56  ;;  %2527 = vmatmul.msk.bf16.vlgmr.msra.gmra.mxu3 %vm74_vm0, %v3318_v56 }
  0xee   :  { %2528 = vmatmul.msk.bf16.vlgmr.msrb.gmra.mxu0 %vm74_vm0, %v3157_v26  ;;  %2529 = vmatmul.msk.bf16.vlgmr.msra.gmra.mxu1 %vm74_vm0, %v3157_v26 }
  0xef   :  { %778 = vmatpush.bf16.msrb.mxu2 %v3320_v57  ;;  %791 = vmatpush.bf16.msra.mxu3 %v3322_v58 }
  0xf0   :  { %806 = vmatpush.bf16.msrb.mxu0 %v3320_v57  ;;  %819 = vmatpush.bf16.msra.mxu1 %v3322_v58 }
  0xf3   :  { %779 = vmatpush.bf16.msrb.mxu2 %v3346_v63  ;;  %792 = vmatpush.bf16.msra.mxu3 %v3348_v1 }
  0xf4   :  { %807 = vmatpush.bf16.msrb.mxu0 %v3346_v63  ;;  %820 = vmatpush.bf16.msra.mxu1 %v3348_v1 }
  0xf7   :  { %780 = vmatpush.bf16.msrb.mxu2 %v3366_v6  ;;  %793 = vmatpush.bf16.msra.mxu3 %v3368_v7 }
  0xf8   :  { %808 = vmatpush.bf16.msrb.mxu0 %v3366_v6  ;;  %821 = vmatpush.bf16.msra.mxu1 %v3368_v7 }
  0xfb   :  { %v154_v10 = vpop.f32.mrf.mxu0  ;;  %v167_v11 = vpop.f32.mrf.mxu1 }
  0xfd   :  { %2530 = vmatmul.msk.bf16.vlgmr.msra.gmra.mxu2 %vm74_vm0, %v3376_v9  ;;  %2531 = vmatmul.msk.bf16.vlgmr.msrb.gmra.mxu3 %vm74_vm0, %v3376_v9 }
  0xfe   :  { %2532 = vmatmul.msk.bf16.vlgmr.msra.gmra.mxu0 %vm74_vm0, %v692_v8  ;;  %2533 = vmatmul.msk.bf16.vlgmr.msrb.gmra.mxu1 %vm74_vm0, %v692_v8 }
  0xff   :  { %836 = vmatpush.bf16.msra.mxu2 %v3320_v57  ;;  %849 = vmatpush.bf16.msrb.mxu3 %v3322_v58 }
 0x100   :  { %v121_v12 = vpop.f32.mrf.mxu2  ;;  %v134_v13 = vpop.f32.mrf.mxu3  ;;  %866 = vmatpush.bf16.msra.mxu0 %v3320_v57  ;;  %879 = vmatpush.bf16.msrb.mxu1 %v3322_v58 }
 0x101   :  { %v138_v14 = vmax.f32 %v3257_v42, %v121_v12  ;;  %v139_v15 = vmax.f32 %v3259_v43, %v134_v13  ;;  %v950_v13 = vpop.permute.xlu0 %949 }
 0x103   :  { %v156_v16 = vpop.f32.mrf.mxu0  ;;  %v169_v17 = vpop.f32.mrf.mxu1  ;;  %v171_v18 = vmax.f32 %v138_v14, %v154_v10  ;;  %v172_v20 = vmax.f32 %v139_v15, %v167_v11  ;;  %837 = vmatpush.bf16.msra.mxu2 %v3346_v63  ;;  %850 = vmatpush.bf16.msrb.mxu3 %v3348_v1 }
 0x104   :  { %867 = vmatpush.bf16.msra.mxu0 %v3346_v63  ;;  %880 = vmatpush.bf16.msrb.mxu1 %v3348_v1 }
 0x107   :  { %838 = vmatpush.bf16.msra.mxu2 %v3366_v6  ;;  %851 = vmatpush.bf16.msrb.mxu3 %v3368_v7 }
 0x108   :  { %v123_v21 = vpop.f32.mrf.mxu2  ;;  %v136_v22 = vpop.f32.mrf.mxu3  ;;  %868 = vmatpush.bf16.msra.mxu0 %v3366_v6  ;;  %881 = vmatpush.bf16.msrb.mxu1 %v3368_v7 }
 0x10b   :  { %v220_v23 = vpop.f32.mrf.mxu0  ;;  %v233_v24 = vpop.f32.mrf.mxu1 }
 0x10d   :  { %2558 = vmatmul.msk.bf16.vlgmr.msrb.gmra.mxu2 %vm770_vm2, %v3067_v0  ;;  %2559 = vmatmul.msk.bf16.vlgmr.msra.gmra.mxu3 %vm770_vm2, %v3067_v0 }
 0x10e   :  { %2560 = vmatmul.msk.bf16.vlgmr.msrb.gmra.mxu0 %vm770_vm2, %v3170_v32  ;;  %2561 = vmatmul.msk.bf16.vlgmr.msra.gmra.mxu1 %vm770_vm2, %v3170_v32 }
 0x10f   :  { %896 = vmatpush.bf16.msrb.mxu2 %v3320_v57  ;;  %909 = vmatpush.bf16.msra.mxu3 %v3322_v58 }
 0x110   :  { %v187_v25 = vpop.f32.mrf.mxu2  ;;  %v200_v27 = vpop.f32.mrf.mxu3  ;;  %926 = vmatpush.bf16.msrb.mxu0 %v3320_v57  ;;  %939 = vmatpush.bf16.msra.mxu1 %v3322_v58 }
 0x111   :  { %v204_v28 = vmax.f32 %v171_v18, %v187_v25  ;;  %v205_v29 = vmax.f32 %v172_v20, %v200_v27 }
 0x113   :  { %v222_v30 = vpop.f32.mrf.mxu0  ;;  %v235_v0 = vpop.f32.mrf.mxu1  ;;  %v237_v36 = vmax.f32 %v204_v28, %v220_v23  ;;  %v238_v37 = vmax.f32 %v205_v29, %v233_v24  ;;  %897 = vmatpush.bf16.msrb.mxu2 %v3346_v63  ;;  %910 = vmatpush.bf16.msra.mxu3 %v3348_v1 }
 0x114   :  { %927 = vmatpush.bf16.msrb.mxu0 %v3346_v63  ;;  %940 = vmatpush.bf16.msra.mxu1 %v3348_v1 }
 0x117   :  { %898 = vmatpush.bf16.msrb.mxu2 %v3366_v6  ;;  %911 = vmatpush.bf16.msra.mxu3 %v3368_v7 }
 0x118   :  { %v189_v38 = vpop.f32.mrf.mxu2  ;;  %v202_v42 = vpop.f32.mrf.mxu3  ;;  %928 = vmatpush.bf16.msrb.mxu0 %v3366_v6  ;;  %941 = vmatpush.bf16.msra.mxu1 %v3368_v7 }
 0x11b   :  { %v286_v43 = vpop.f32.mrf.mxu0  ;;  %v299_v45 = vpop.f32.mrf.mxu1 }
 0x11d   :  { %2562 = vmatmul.msk.bf16.vlgmr.msra.gmra.mxu2 %vm770_vm2, %v3168_v31  ;;  %2563 = vmatmul.msk.bf16.vlgmr.msrb.gmra.mxu3 %vm770_vm2, %v3168_v31 }
 0x11e   :  { %2564 = vmatmul.msk.bf16.vlgmr.msra.gmra.mxu0 %vm770_vm2, %v3189_v33  ;;  %2565 = vmatmul.msk.bf16.vlgmr.msrb.gmra.mxu1 %vm770_vm2, %v3189_v33 }
 0x11f   :  { %963 = vmatpush.bf16.msra.mxu2 %v3320_v57  ;;  %976 = vmatpush.bf16.msrb.mxu3 %v3322_v58 }
 0x120   :  { %v253_v46 = vpop.f32.mrf.mxu2  ;;  %v266_v49 = vpop.f32.mrf.mxu3  ;;  %993 = vmatpush.bf16.msra.mxu0 %v3320_v57  ;;  %1006 = vmatpush.bf16.msrb.mxu1 %v3322_v58 }
 0x121   :  { %v270_v50 = vmax.f32 %v237_v36, %v253_v46  ;;  %v271_v51 = vmax.f32 %v238_v37, %v266_v49 }
 0x123   :  { %v288_v52 = vpop.f32.mrf.mxu0  ;;  %v301_v53 = vpop.f32.mrf.mxu1  ;;  %v303_v54 = vmax.f32 %v270_v50, %v286_v43  ;;  %v304_v55 = vmax.f32 %v271_v51, %v299_v45  ;;  %964 = vmatpush.bf16.msra.mxu2 %v3346_v63  ;;  %977 = vmatpush.bf16.msrb.mxu3 %v3348_v1 }
 0x124   :  { %994 = vmatpush.bf16.msra.mxu0 %v3346_v63  ;;  %1007 = vmatpush.bf16.msrb.mxu1 %v3348_v1 }
 0x127   :  { %965 = vmatpush.bf16.msra.mxu2 %v3366_v6  ;;  %978 = vmatpush.bf16.msrb.mxu3 %v3368_v7 }
 0x128   :  { %v255_v59 = vpop.f32.mrf.mxu2  ;;  %v268_v60 = vpop.f32.mrf.mxu3  ;;  %995 = vmatpush.bf16.msra.mxu0 %v3366_v6  ;;  %1008 = vmatpush.bf16.msrb.mxu1 %v3368_v7 }
 0x12b   :  { %v361_v61 = vpop.f32.mrf.mxu0  ;;  %v374_v62 = vpop.f32.mrf.mxu1 }
 0x12d   :  { %2566 = vmatmul.msk.bf16.vlgmr.msrb.gmra.mxu2 %vm770_vm2, %v3192_v34  ;;  %2567 = vmatmul.msk.bf16.vlgmr.msra.gmra.mxu3 %vm770_vm2, %v3192_v34 }
 0x12e   :  { %2568 = vmatmul.msk.bf16.vlgmr.msrb.gmra.mxu0 %vm770_vm2, %v3206_v35  ;;  %2569 = vmatmul.msk.bf16.vlgmr.msra.gmra.mxu1 %vm770_vm2, %v3206_v35  ;;  %v952_v35 = vpop.permute.xlu1 %951 }
 0x12f   :  { %1023 = vmatpush.bf16.msrb.mxu2 %v3320_v57  ;;  %1036 = vmatpush.bf16.msra.mxu3 %v3322_v58  ;;  %v3459_v16 = vsel %vm74_vm0, %v950_v13, %v952_v35 }
 0x130   :  { %v329_v2 = vpop.f32.mrf.mxu2  ;;  %v342_v3 = vpop.f32.mrf.mxu3  ;;  %1053 = vmatpush.bf16.msrb.mxu0 %v3320_v57  ;;  %1066 = vmatpush.bf16.msra.mxu1 %v3322_v58 }
 0x131   :  { %v346_v4 = vmax.f32 %v303_v54, %v329_v2  ;;  %v347_v5 = vmax.f32 %v304_v55, %v342_v3 }
 0x133   :  { %v363_v8 = vpop.f32.mrf.mxu0  ;;  %v376_v10 = vpop.f32.mrf.mxu1  ;;  %v378_v11 = vmax.f32 %v346_v4, %v361_v61  ;;  %v379_v12 = vmax.f32 %v347_v5, %v374_v62  ;;  %1024 = vmatpush.bf16.msrb.mxu2 %v3346_v63  ;;  %1037 = vmatpush.bf16.msra.mxu3 %v3348_v1 }
 0x134   :  { %1054 = vmatpush.bf16.msrb.mxu0 %v3346_v63  ;;  %1067 = vmatpush.bf16.msra.mxu1 %v3348_v1 }
 0x137   :  { %1025 = vmatpush.bf16.msrb.mxu2 %v3366_v6  ;;  %1038 = vmatpush.bf16.msra.mxu3 %v3368_v7 }
 0x138   :  { %v331_v14 = vpop.f32.mrf.mxu2  ;;  %v344_v15 = vpop.f32.mrf.mxu3  ;;  %1055 = vmatpush.bf16.msrb.mxu0 %v3366_v6  ;;  %1068 = vmatpush.bf16.msra.mxu1 %v3368_v7 }
 0x13b   :  { %v430_v17 = vpop.f32.mrf.mxu0  ;;  %v443_v18 = vpop.f32.mrf.mxu1 }
 0x13d   :  { %2570 = vmatmul.msk.bf16.vlgmr.msra.gmra.mxu2 %vm770_vm2, %v3459_v16  ;;  %2571 = vmatmul.msk.bf16.vlgmr.msrb.gmra.mxu3 %vm770_vm2, %v3459_v16 }
 0x13e   :  { %2572 = vmatmul.msk.bf16.vlgmr.msra.gmra.mxu0 %vm770_vm2, %v3227_v39  ;;  %2573 = vmatmul.msk.bf16.vlgmr.msrb.gmra.mxu1 %vm770_vm2, %v3227_v39 }
 0x13f   :  { %1083 = vmatpush.bf16.msra.mxu2 %v3320_v57  ;;  %1096 = vmatpush.bf16.msrb.mxu3 %v3322_v58 }
 0x140   :  { %v397_v20 = vpop.f32.mrf.mxu2  ;;  %v410_v21 = vpop.f32.mrf.mxu3  ;;  %1113 = vmatpush.bf16.msra.mxu0 %v3320_v57  ;;  %1126 = vmatpush.bf16.msrb.mxu1 %v3322_v58 }
 0x141   :  { %v414_v22 = vmax.f32 %v378_v11, %v397_v20  ;;  %v415_v23 = vmax.f32 %v379_v12, %v410_v21  ;;  %v1199_v20 = vpop.permute.xlu0 %1198 }
 0x143   :  { %v432_v24 = vpop.f32.mrf.mxu0  ;;  %v445_v25 = vpop.f32.mrf.mxu1  ;;  %v447_v27 = vmax.f32 %v414_v22, %v430_v17  ;;  %v448_v28 = vmax.f32 %v415_v23, %v443_v18  ;;  %1084 = vmatpush.bf16.msra.mxu2 %v3346_v63  ;;  %1097 = vmatpush.bf16.msrb.mxu3 %v3348_v1  ;;  %v2623_v22 = vld [vmem:[%s3952_s3 + $0x38] sm:$0xf0] }
 0x144   :  { %1114 = vmatpush.bf16.msra.mxu0 %v3346_v63  ;;  %1127 = vmatpush.bf16.msrb.mxu1 %v3348_v1 }
 0x147   :  { %1085 = vmatpush.bf16.msra.mxu2 %v3366_v6  ;;  %1098 = vmatpush.bf16.msrb.mxu3 %v3368_v7 }
 0x148   :  { %v399_v29 = vpop.f32.mrf.mxu2  ;;  %v412_v30 = vpop.f32.mrf.mxu3  ;;  %1115 = vmatpush.bf16.msra.mxu0 %v3366_v6  ;;  %1128 = vmatpush.bf16.msrb.mxu1 %v3368_v7 }
 0x149   :  { %v2900_v29 = vld [vmem:[%s3952_s3 + $0x24] sm:$0xf]  ;;  %v2615_v30 = vld [vmem:[%s3952_s3 + $0x28] sm:$0xf0] }
 0x14b   :  { %v496_v0 = vpop.f32.mrf.mxu0  ;;  %v509_v36 = vpop.f32.mrf.mxu1 }
 0x14d   :  { %2574 = vmatmul.msk.bf16.vlgmr.msrb.gmra.mxu2 %vm770_vm2, %v3119_v19  ;;  %2575 = vmatmul.msk.bf16.vlgmr.msra.gmra.mxu3 %vm770_vm2, %v3119_v19 }
 0x14e   :  { %2576 = vmatmul.msk.bf16.vlgmr.msrb.gmra.mxu0 %vm770_vm2, %v3245_v40  ;;  %2577 = vmatmul.msk.bf16.vlgmr.msra.gmra.mxu1 %vm770_vm2, %v3245_v40 }
 0x14f   :  { %1143 = vmatpush.bf16.msrb.mxu2 %v3320_v57  ;;  %1156 = vmatpush.bf16.msra.mxu3 %v3322_v58 }
 0x150   :  { %v463_v37 = vpop.f32.mrf.mxu2  ;;  %v476_v38 = vpop.f32.mrf.mxu3  ;;  %1173 = vmatpush.bf16.msrb.mxu0 %v3320_v57  ;;  %1186 = vmatpush.bf16.msra.mxu1 %v3322_v58 }
 0x151   :  { %v480_v42 = vmax.f32 %v447_v27, %v463_v37  ;;  %v481_v43 = vmax.f32 %v448_v28, %v476_v38  ;;  %v2613_v27 = vld [vmem:[%s3952_s3 + $0x20] sm:$0xf]  ;;  %v2901_v28 = vld [vmem:[%s3952_s3 + $0x24] sm:$0xf0]  ;;  %v2605_v37 = vld [vmem:[%s3952_s3 + $0x10] sm:$0xf] }
 0x152   :  { %v2899_v38 = vld [vmem:[%s3952_s3 + $0x14] sm:$0xf0] }
 0x153   :  { %v498_v45 = vpop.f32.mrf.mxu0  ;;  %v511_v19 = vpop.f32.mrf.mxu1  ;;  %v513_v46 = vmax.f32 %v480_v42, %v496_v0  ;;  %v514_v49 = vmax.f32 %v481_v43, %v509_v36  ;;  %1144 = vmatpush.bf16.msrb.mxu2 %v3346_v63  ;;  %1157 = vmatpush.bf16.msra.mxu3 %v3348_v1  ;;  %v3582_v0 = vor.u32 %v2901_v28, %v2613_v27 }
 0x154   :  { %1174 = vmatpush.bf16.msrb.mxu0 %v3346_v63  ;;  %1187 = vmatpush.bf16.msra.mxu1 %v3348_v1  ;;  %v3584_v36 = vor.u32 %v2900_v29, %v2615_v30  ;;  %v2898_v45 = vld [vmem:[%s3952_s3 + $0x14] sm:$0xf]  ;;  %v2607_v19 = vld [vmem:[%s3952_s3 + $0x18] sm:$0xf0] }
 0x157   :  { %1145 = vmatpush.bf16.msrb.mxu2 %v3366_v6  ;;  %1158 = vmatpush.bf16.msra.mxu3 %v3368_v7 }
 0x158   :  { %v465_v50 = vpop.f32.mrf.mxu2  ;;  %v478_v51 = vpop.f32.mrf.mxu3  ;;  %1175 = vmatpush.bf16.msrb.mxu0 %v3366_v6  ;;  %1188 = vmatpush.bf16.msra.mxu1 %v3368_v7 }
 0x159   :  { %v3600_v50 = vor.u32 %v2899_v38, %v2605_v37 }
 0x15b   :  { %v562_v52 = vpop.f32.mrf.mxu0  ;;  %v575_v53 = vpop.f32.mrf.mxu1 }
 0x15d   :  { %2578 = vmatmul.msk.bf16.vlgmr.msra.gmra.mxu2 %vm770_vm2, %v3247_v41  ;;  %2579 = vmatmul.msk.bf16.vlgmr.msrb.gmra.mxu3 %vm770_vm2, %v3247_v41 }
 0x15e   :  { %2580 = vmatmul.msk.bf16.vlgmr.msra.gmra.mxu0 %vm770_vm2, %v3265_v44  ;;  %2581 = vmatmul.msk.bf16.vlgmr.msrb.gmra.mxu1 %vm770_vm2, %v3265_v44 }
 0x15f   :  { %1209 = vmatpush.bf16.msra.mxu2 %v3320_v57  ;;  %1222 = vmatpush.bf16.msrb.mxu3 %v3322_v58 }
 0x160   :  { %v529_v54 = vpop.f32.mrf.mxu2  ;;  %v542_v55 = vpop.f32.mrf.mxu3  ;;  %1239 = vmatpush.bf16.msra.mxu0 %v3320_v57  ;;  %1252 = vmatpush.bf16.msrb.mxu1 %v3322_v58 }
 0x161   :  { %v546_v59 = vmax.f32 %v513_v46, %v529_v54  ;;  %v547_v60 = vmax.f32 %v514_v49, %v542_v55  ;;  %v3608_v55 = vor.u32 %v2898_v45, %v2607_v19  ;;  %v1531_v19 = vpop.permute.xlu1 %1530 }
 0x163   :  { %v564_v61 = vpop.f32.mrf.mxu0  ;;  %v577_v62 = vpop.f32.mrf.mxu1  ;;  %v579_v2 = vmax.f32 %v546_v59, %v562_v52  ;;  %v580_v3 = vmax.f32 %v547_v60, %v575_v53  ;;  %1210 = vmatpush.bf16.msra.mxu2 %v3346_v63  ;;  %1223 = vmatpush.bf16.msrb.mxu3 %v3348_v1  ;;  %v2597_v59 = vld [vmem:[%s3952_s3] sm:$0xf]  ;;  %v2897_v60 = vld [vmem:[%s3952_s3 + $0x4] sm:$0xf0] }
 0x164   :  { %1240 = vmatpush.bf16.msra.mxu0 %v3346_v63  ;;  %1253 = vmatpush.bf16.msrb.mxu1 %v3348_v1  ;;  %v2896_v61 = vld [vmem:[%s3952_s3 + $0x4] sm:$0xf]  ;;  %v2599_v62 = vld [vmem:[%s3952_s3 + $0x8] sm:$0xf0] }
 0x167   :  { %1211 = vmatpush.bf16.msra.mxu2 %v3366_v6  ;;  %1224 = vmatpush.bf16.msrb.mxu3 %v3368_v7 }
 0x168   :  { %v531_v4 = vpop.f32.mrf.mxu2  ;;  %v544_v5 = vpop.f32.mrf.mxu3  ;;  %1241 = vmatpush.bf16.msra.mxu0 %v3366_v6  ;;  %1254 = vmatpush.bf16.msrb.mxu1 %v3368_v7 }
 0x16b   :  { %v636_v8 = vpop.f32.mrf.mxu0  ;;  %v649_v10 = vpop.f32.mrf.mxu1 }
 0x16d   :  { %2582 = vmatmul.msk.bf16.vlgmr.msrb.gmra.mxu2 %vm770_vm2, %v3271_v47  ;;  %2583 = vmatmul.msk.bf16.vlgmr.msra.gmra.mxu3 %vm770_vm2, %v3271_v47 }
 0x16e   :  { %2584 = vmatmul.msk.bf16.vlgmr.msrb.gmra.mxu0 %vm770_vm2, %v3289_v48  ;;  %2585 = vmatmul.msk.bf16.vlgmr.msra.gmra.mxu1 %vm770_vm2, %v3289_v48  ;;  %v1197_v48 = vpop.permute.xlu2 %1196 }
 0x16f   :  { %1269 = vmatpush.bf16.msrb.mxu2 %v3320_v57  ;;  %1282 = vmatpush.bf16.msra.mxu3 %v3322_v58  ;;  %v3554_v23 = vsel %vm74_vm0, %v1197_v48, %v1199_v20  ;;  %v2971_v48 = vld [vmem:[%s3949_s0] sm:$0xf] }
 0x170   :  { %v604_v11 = vpop.f32.mrf.mxu2  ;;  %v617_v12 = vpop.f32.mrf.mxu3  ;;  %1299 = vmatpush.bf16.msrb.mxu0 %v3320_v57  ;;  %1312 = vmatpush.bf16.msra.mxu1 %v3322_v58  ;;  %v2621_v57 = vld [vmem:[%s3952_s3 + $0x30] sm:$0xf] }
 0x171   :  { %v621_v35 = vmax.f32 %v579_v2, %v604_v11  ;;  %v622_v13 = vmax.f32 %v580_v3, %v617_v12  ;;  %v3626_v2 = vor.u32 %v2897_v60, %v2597_v59  ;;  %v3628_v3 = vor.u32 %v2896_v61, %v2599_v62 }
 0x173   :  { %v638_v14 = vpop.f32.mrf.mxu0  ;;  %v651_v15 = vpop.f32.mrf.mxu1  ;;  %v653_v17 = vmax.f32 %v621_v35, %v636_v8  ;;  %v654_v18 = vmax.f32 %v622_v13, %v649_v10  ;;  %1270 = vmatpush.bf16.msrb.mxu2 %v3346_v63  ;;  %1283 = vmatpush.bf16.msra.mxu3 %v3348_v1 }
 0x174   :  { %1300 = vmatpush.bf16.msrb.mxu0 %v3346_v63  ;;  %1313 = vmatpush.bf16.msra.mxu1 %v3348_v1  ;;  %v2903_v63 = vld [vmem:[%s3952_s3 + $0x34] sm:$0xf0]  ;;  %v2902_v1 = vld [vmem:[%s3952_s3 + $0x34] sm:$0xf] }
 0x177   :  { %1271 = vmatpush.bf16.msrb.mxu2 %v3366_v6  ;;  %1284 = vmatpush.bf16.msra.mxu3 %v3368_v7 }
 0x178   :  { %v606_v58 = vpop.f32.mrf.mxu2  ;;  %v619_v21 = vpop.f32.mrf.mxu3  ;;  %1301 = vmatpush.bf16.msrb.mxu0 %v3366_v6  ;;  %1314 = vmatpush.bf16.msra.mxu1 %v3368_v7  ;;  %v3556_v6 = vor.u32 %v2903_v63, %v2621_v57  ;;  %v3558_v7 = vor.u32 %v2902_v1, %v2623_v22 }
 0x17b   :  { %v705_v24 = vpop.f32.mrf.mxu0  ;;  %v718_v25 = vpop.f32.mrf.mxu1 }
 0x17d   :  { %2586 = vmatmul.msk.bf16.vlgmr.msra.gmra.mxu2 %vm770_vm2, %v3554_v23  ;;  %2587 = vmatmul.msk.bf16.vlgmr.msrb.gmra.mxu3 %vm770_vm2, %v3554_v23 }
 0x17e   :  { %2588 = vmatmul.msk.bf16.vlgmr.msra.gmra.mxu0 %vm770_vm2, %v3318_v56  ;;  %2589 = vmatmul.msk.bf16.vlgmr.msrb.gmra.mxu1 %vm770_vm2, %v3318_v56 }
 0x17f   :  { %1388 = vmatpush.bf16.msra.mxu2 %v3556_v6  ;;  %1401 = vmatpush.bf16.msrb.mxu3 %v3558_v7 }
 0x180   :  { %v672_v42 = vpop.f32.mrf.mxu2  ;;  %v685_v43 = vpop.f32.mrf.mxu3  ;;  %1416 = vmatpush.bf16.msra.mxu0 %v3556_v6  ;;  %1429 = vmatpush.bf16.msrb.mxu1 %v3558_v7 }
 0x181   :  { %v689_v46 = vmax.f32 %v653_v17, %v672_v42  ;;  %v690_v49 = vmax.f32 %v654_v18, %v685_v43 }
 0x183   :  { %v3602_v51 = vmax.f32 %v689_v46, %v705_v24  ;;  %v3604_v52 = vmax.f32 %v690_v49, %v718_v25  ;;  %v707_v53 = vpop.f32.mrf.mxu0  ;;  %v720_v54 = vpop.f32.mrf.mxu1  ;;  %1389 = vmatpush.bf16.msra.mxu2 %v3582_v0  ;;  %1402 = vmatpush.bf16.msrb.mxu3 %v3584_v36 }
 0x184   :  { %1417 = vmatpush.bf16.msra.mxu0 %v3582_v0  ;;  %1430 = vmatpush.bf16.msrb.mxu1 %v3584_v36 }
 0x187   :  { %1390 = vmatpush.bf16.msra.mxu2 %v3600_v50  ;;  %1403 = vmatpush.bf16.msrb.mxu3 %v3608_v55 }
 0x188   :  { %v674_v4 = vpop.f32.mrf.mxu2  ;;  %v687_v5 = vpop.f32.mrf.mxu3  ;;  %1418 = vmatpush.bf16.msra.mxu0 %v3600_v50  ;;  %1431 = vmatpush.bf16.msrb.mxu1 %v3608_v55 }
 0x18b   :  { %v810_v8 = vpop.f32.mrf.mxu0  ;;  %v823_v10 = vpop.f32.mrf.mxu1  ;;  %1391 = vmatpush.bf16.msra.mxu2 %v3626_v2  ;;  %1404 = vmatpush.bf16.msrb.mxu3 %v3628_v3 }
 0x18c   :  { %1419 = vmatpush.bf16.msra.mxu0 %v3626_v2  ;;  %1432 = vmatpush.bf16.msrb.mxu1 %v3628_v3 }
 0x18d   :  { %2590 = vmatmul.msk.bf16.vlgmr.msrb.gmra.mxu2 %vm770_vm2, %v3157_v26  ;;  %2591 = vmatmul.msk.bf16.vlgmr.msra.gmra.mxu3 %vm770_vm2, %v3157_v26 }
 0x18e   :  { %2592 = vmatmul.msk.bf16.vlgmr.msrb.gmra.mxu0 %vm770_vm2, %v3376_v9  ;;  %2593 = vmatmul.msk.bf16.vlgmr.msra.gmra.mxu1 %vm770_vm2, %v3376_v9 }
 0x18f   :  { %1446 = vmatpush.bf16.msrb.mxu2 %v3556_v6  ;;  %1459 = vmatpush.bf16.msra.mxu3 %v3558_v7 }
 0x190   :  { %v782_v11 = vpop.f32.mrf.mxu2  ;;  %v795_v12 = vpop.f32.mrf.mxu3  ;;  %1476 = vmatpush.bf16.msrb.mxu0 %v3556_v6  ;;  %1489 = vmatpush.bf16.msra.mxu1 %v3558_v7 }
 0x191   :  { %v827_v35 = vmax.f32 %v782_v11, %v810_v8  ;;  %v828_v13 = vmax.f32 %v795_v12, %v823_v10 }
 0x193   :  { %v812_v14 = vpop.f32.mrf.mxu0  ;;  %v825_v26 = vpop.f32.mrf.mxu1  ;;  %1447 = vmatpush.bf16.msrb.mxu2 %v3582_v0  ;;  %1460 = vmatpush.bf16.msra.mxu3 %v3584_v36 }
 0x194   :  { %1477 = vmatpush.bf16.msrb.mxu0 %v3582_v0  ;;  %1490 = vmatpush.bf16.msra.mxu1 %v3584_v36 }
 0x197   :  { %1448 = vmatpush.bf16.msrb.mxu2 %v3600_v50  ;;  %1461 = vmatpush.bf16.msra.mxu3 %v3608_v55 }
 0x198   :  { %v784_v9 = vpop.f32.mrf.mxu2  ;;  %v797_v15 = vpop.f32.mrf.mxu3  ;;  %1478 = vmatpush.bf16.msrb.mxu0 %v3600_v50  ;;  %1491 = vmatpush.bf16.msra.mxu1 %v3608_v55 }
 0x19b   :  { %v870_v17 = vpop.f32.mrf.mxu0  ;;  %v883_v18 = vpop.f32.mrf.mxu1  ;;  %1449 = vmatpush.bf16.msrb.mxu2 %v3626_v2  ;;  %1462 = vmatpush.bf16.msra.mxu3 %v3628_v3 }
 0x19c   :  { %1479 = vmatpush.bf16.msrb.mxu0 %v3626_v2  ;;  %1492 = vmatpush.bf16.msra.mxu1 %v3628_v3 }
 0x19d   :  { %2627 = vmatmul.msk.bf16.vlgmr.msra.gmra.mxu2 %vm1381_vm3, %v2971_v48  ;;  %2628 = vmatmul.msk.bf16.vlgmr.msrb.gmra.mxu3 %vm1381_vm3, %v2971_v48  ;;  %v2972_v48 = vld [vmem:[%s3949_s0 + $0x4] sm:$0xf] }
 0x19e   :  { %2629 = vmatmul.msk.bf16.vlgmr.msra.gmra.mxu0 %vm1381_vm3, %v3170_v32  ;;  %2630 = vmatmul.msk.bf16.vlgmr.msrb.gmra.mxu1 %vm1381_vm3, %v3170_v32 }
 0x19f   :  { %1506 = vmatpush.bf16.msra.mxu2 %v3556_v6  ;;  %1519 = vmatpush.bf16.msrb.mxu3 %v3558_v7 }
 0x1a0   :  { %v840_v20 = vpop.f32.mrf.mxu2  ;;  %v853_v57 = vpop.f32.mrf.mxu3  ;;  %1543 = vmatpush.bf16.msra.mxu0 %v3556_v6  ;;  %1556 = vmatpush.bf16.msrb.mxu1 %v3558_v7 }
 0x1a1   :  { %v857_v58 = vmax.f32 %v827_v35, %v840_v20  ;;  %v858_v21 = vmax.f32 %v828_v13, %v853_v57 }
 0x1a3   :  { %v872_v63 = vpop.f32.mrf.mxu0  ;;  %v885_v1 = vpop.f32.mrf.mxu1  ;;  %v887_v22 = vmax.f32 %v857_v58, %v870_v17  ;;  %v888_v24 = vmax.f32 %v858_v21, %v883_v18  ;;  %1507 = vmatpush.bf16.msra.mxu2 %v3582_v0  ;;  %1520 = vmatpush.bf16.msrb.mxu3 %v3584_v36 }
 0x1a4   :  { %1544 = vmatpush.bf16.msra.mxu0 %v3582_v0  ;;  %1557 = vmatpush.bf16.msrb.mxu1 %v3584_v36 }
 0x1a7   :  { %1508 = vmatpush.bf16.msra.mxu2 %v3600_v50  ;;  %1521 = vmatpush.bf16.msrb.mxu3 %v3608_v55 }
 0x1a8   :  { %v842_v32 = vpop.f32.mrf.mxu2  ;;  %v855_v25 = vpop.f32.mrf.mxu3  ;;  %1545 = vmatpush.bf16.msra.mxu0 %v3600_v50  ;;  %1558 = vmatpush.bf16.msrb.mxu1 %v3608_v55 }
 0x1ab   :  { %v930_v27 = vpop.f32.mrf.mxu0  ;;  %v943_v28 = vpop.f32.mrf.mxu1  ;;  %1509 = vmatpush.bf16.msra.mxu2 %v3626_v2  ;;  %1522 = vmatpush.bf16.msrb.mxu3 %v3628_v3 }
 0x1ac   :  { %1546 = vmatpush.bf16.msra.mxu0 %v3626_v2  ;;  %1559 = vmatpush.bf16.msrb.mxu1 %v3628_v3 }
 0x1ad   :  { %2631 = vmatmul.msk.bf16.vlgmr.msrb.gmra.mxu2 %vm1381_vm3, %v3168_v31  ;;  %2632 = vmatmul.msk.bf16.vlgmr.msra.gmra.mxu3 %vm1381_vm3, %v3168_v31 }
 0x1ae   :  { %2633 = vmatmul.msk.bf16.vlgmr.msrb.gmra.mxu0 %vm1381_vm3, %v3189_v33  ;;  %2634 = vmatmul.msk.bf16.vlgmr.msra.gmra.mxu1 %vm1381_vm3, %v3189_v33  ;;  %v1533_v33 = vpop.permute.xlu2 %1532 }
 0x1af   :  { %1573 = vmatpush.bf16.msrb.mxu2 %v3556_v6  ;;  %1586 = vmatpush.bf16.msra.mxu3 %v3558_v7  ;;  %v1535_v59 = vsel %vm770_vm2, %v1531_v19, %v1533_v33 }
 0x1b0   :  { %v900_v29 = vpop.f32.mrf.mxu2  ;;  %v913_v30 = vpop.f32.mrf.mxu3  ;;  %1603 = vmatpush.bf16.msrb.mxu0 %v3556_v6  ;;  %1616 = vmatpush.bf16.msra.mxu1 %v3558_v7 }
 0x1b1   :  { %v917_v37 = vmax.f32 %v887_v22, %v900_v29  ;;  %v918_v38 = vmax.f32 %v888_v24, %v913_v30 }
 0x1b3   :  { %v932_v42 = vpop.f32.mrf.mxu0  ;;  %v945_v31 = vpop.f32.mrf.mxu1  ;;  %v947_v43 = vmax.f32 %v917_v37, %v930_v27  ;;  %v948_v45 = vmax.f32 %v918_v38, %v943_v28  ;;  %1574 = vmatpush.bf16.msrb.mxu2 %v3582_v0  ;;  %1587 = vmatpush.bf16.msra.mxu3 %v3584_v36 }
 0x1b4   :  { %1604 = vmatpush.bf16.msrb.mxu0 %v3582_v0  ;;  %1617 = vmatpush.bf16.msra.mxu1 %v3584_v36 }
 0x1b7   :  { %1575 = vmatpush.bf16.msrb.mxu2 %v3600_v50  ;;  %1588 = vmatpush.bf16.msra.mxu3 %v3608_v55 }
 0x1b8   :  { %v902_v46 = vpop.f32.mrf.mxu2  ;;  %v915_v49 = vpop.f32.mrf.mxu3  ;;  %1605 = vmatpush.bf16.msrb.mxu0 %v3600_v50  ;;  %1618 = vmatpush.bf16.msra.mxu1 %v3608_v55 }
 0x1bb   :  { %v3705_v53 = vpop.f32.mrf.mxu0  ;;  %v3707_v54 = vpop.f32.mrf.mxu1  ;;  %1576 = vmatpush.bf16.msrb.mxu2 %v3626_v2  ;;  %1589 = vmatpush.bf16.msra.mxu3 %v3628_v3 }
 0x1bc   :  { %1606 = vmatpush.bf16.msrb.mxu0 %v3626_v2  ;;  %1619 = vmatpush.bf16.msra.mxu1 %v3628_v3 }
 0x1bd   :  { %2635 = vmatmul.msk.bf16.vlgmr.msra.gmra.mxu2 %vm1381_vm3, %v3192_v34  ;;  %2636 = vmatmul.msk.bf16.vlgmr.msrb.gmra.mxu3 %vm1381_vm3, %v3192_v34 }
 0x1be   :  { %2637 = vmatmul.msk.bf16.vlgmr.msra.gmra.mxu0 %vm1381_vm3, %v1535_v59  ;;  %2638 = vmatmul.msk.bf16.vlgmr.msrb.gmra.mxu1 %vm1381_vm3, %v1535_v59 }
 0x1bf   :  { %1633 = vmatpush.bf16.msra.mxu2 %v3556_v6  ;;  %1646 = vmatpush.bf16.msrb.mxu3 %v3558_v7 }
 0x1c0   :  { %1663 = vmatpush.bf16.msra.mxu0 %v3556_v6  ;;  %1676 = vmatpush.bf16.msrb.mxu1 %v3558_v7  ;;  %v967_v60 = vpop.f32.mrf.mxu2  ;;  %v980_v61 = vpop.f32.mrf.mxu3 }
 0x1c1   :  { %v3724_v62 = vmax.f32 %v947_v43, %v967_v60  ;;  %v3726_v4 = vmax.f32 %v948_v45, %v980_v61  ;;  %v2927_v43 = vld [vmem:[#allocation2 + $0xb8] sm:$0xff] }
 0x1c2   :  { %v2935_v45 = vld [vmem:[#allocation2 + $0xf8] sm:$0xff] }
 0x1c3   :  { %v999_v5 = vpop.f32.mrf.mxu0  ;;  %v1012_v34 = vpop.f32.mrf.mxu1  ;;  %v1014_v8 = vmax.f32 %v3724_v62, %v3705_v53  ;;  %v1015_v10 = vmax.f32 %v3726_v4, %v3707_v54  ;;  %1634 = vmatpush.bf16.msra.mxu2 %v3582_v0  ;;  %1647 = vmatpush.bf16.msrb.mxu3 %v3584_v36  ;;  %v2926_v53 = vld [vmem:[#allocation2 + $0xb0] sm:$0xff] }
 0x1c4   :  { %1664 = vmatpush.bf16.msra.mxu0 %v3582_v0  ;;  %1677 = vmatpush.bf16.msrb.mxu1 %v3584_v36  ;;  %v2934_v54 = vld [vmem:[#allocation2 + $0xf0] sm:$0xff]  ;;  %v2925_v5 = vld [vmem:[#allocation2 + $0xa8] sm:$0xff] }
 0x1c5   :  { %v2933_v34 = vld [vmem:[#allocation2 + $0xe8] sm:$0xff] }
 0x1c7   :  { %1635 = vmatpush.bf16.msra.mxu2 %v3600_v50  ;;  %1648 = vmatpush.bf16.msrb.mxu3 %v3608_v55 }
 0x1c8   :  { %1665 = vmatpush.bf16.msra.mxu0 %v3600_v50  ;;  %1678 = vmatpush.bf16.msrb.mxu1 %v3608_v55  ;;  %v969_v11 = vpop.f32.mrf.mxu2  ;;  %v982_v12 = vpop.f32.mrf.mxu3 }
 0x1cb   :  { %v3740_v35 = vpop.f32.mrf.mxu0  ;;  %v3742_v13 = vpop.f32.mrf.mxu1  ;;  %1636 = vmatpush.bf16.msra.mxu2 %v3626_v2  ;;  %1649 = vmatpush.bf16.msrb.mxu3 %v3628_v3 }
 0x1cc   :  { %1666 = vmatpush.bf16.msra.mxu0 %v3626_v2  ;;  %1679 = vmatpush.bf16.msrb.mxu1 %v3628_v3 }
 0x1cd   :  { %2639 = vmatmul.msk.bf16.vlgmr.msrb.gmra.mxu2 %vm1381_vm3, %v3459_v16  ;;  %2640 = vmatmul.msk.bf16.vlgmr.msra.gmra.mxu3 %vm1381_vm3, %v3459_v16 }
 0x1ce   :  { %2641 = vmatmul.msk.bf16.vlgmr.msrb.gmra.mxu0 %vm1381_vm3, %v3227_v39  ;;  %2642 = vmatmul.msk.bf16.vlgmr.msra.gmra.mxu1 %vm1381_vm3, %v3227_v39 }
 0x1cf   :  { %1693 = vmatpush.bf16.msrb.mxu2 %v3556_v6  ;;  %1706 = vmatpush.bf16.msra.mxu3 %v3558_v7 }
 0x1d0   :  { %1723 = vmatpush.bf16.msrb.mxu0 %v3556_v6  ;;  %1736 = vmatpush.bf16.msra.mxu1 %v3558_v7  ;;  %v3758_v14 = vpop.f32.mrf.mxu2  ;;  %v3760_v26 = vpop.f32.mrf.mxu3 }
 0x1d1   :  { %v1044_v30 = vmax.f32 %v1014_v8, %v3758_v14  ;;  %v1045_v37 = vmax.f32 %v1015_v10, %v3760_v26 }
 0x1d3   :  { %v1059_v9 = vpop.f32.mrf.mxu0  ;;  %v1072_v16 = vpop.f32.mrf.mxu1  ;;  %1694 = vmatpush.bf16.msrb.mxu2 %v3582_v0  ;;  %1707 = vmatpush.bf16.msra.mxu3 %v3584_v36  ;;  %v1074_v33 = vmax.f32 %v1044_v30, %v3740_v35  ;;  %v1075_v19 = vmax.f32 %v1045_v37, %v3742_v13 }
 0x1d4   :  { %1724 = vmatpush.bf16.msrb.mxu0 %v3582_v0  ;;  %1737 = vmatpush.bf16.msra.mxu1 %v3584_v36  ;;  %v2923_v9 = vld [vmem:[#allocation2 + $0x98] sm:$0xff] }
 0x1d5   :  { %v2931_v16 = vld [vmem:[#allocation2 + $0xd8] sm:$0xff] }
 0x1d7   :  { %1695 = vmatpush.bf16.msrb.mxu2 %v3600_v50  ;;  %1708 = vmatpush.bf16.msra.mxu3 %v3608_v55 }
 0x1d8   :  { %1725 = vmatpush.bf16.msrb.mxu0 %v3600_v50  ;;  %1738 = vmatpush.bf16.msra.mxu1 %v3608_v55  ;;  %v1029_v39 = vpop.f32.mrf.mxu2  ;;  %v1042_v15 = vpop.f32.mrf.mxu3 }
 0x1d9   :  { %v2911_v39 = vld [vmem:[#allocation2 + $0x38] sm:$0xff]  ;;  %v2922_v15 = vld [vmem:[#allocation2 + $0x90] sm:$0xff] }
 0x1db   :  { %v3772_v17 = vpop.f32.mrf.mxu0  ;;  %v3774_v18 = vpop.f32.mrf.mxu1  ;;  %1696 = vmatpush.bf16.msrb.mxu2 %v3626_v2  ;;  %1709 = vmatpush.bf16.msra.mxu3 %v3628_v3 }
 0x1dc   :  { %1726 = vmatpush.bf16.msrb.mxu0 %v3626_v2  ;;  %1739 = vmatpush.bf16.msra.mxu1 %v3628_v3 }
 0x1dd   :  { %2643 = vmatmul.msk.bf16.vlgmr.msra.gmra.mxu2 %vm1381_vm3, %v2972_v48  ;;  %2644 = vmatmul.msk.bf16.vlgmr.msrb.gmra.mxu3 %vm1381_vm3, %v2972_v48  ;;  %v2910_v48 = vld [vmem:[#allocation2 + $0x30] sm:$0xff] }
 0x1de   :  { %2645 = vmatmul.msk.bf16.vlgmr.msra.gmra.mxu0 %vm1381_vm3, %v3245_v40  ;;  %2646 = vmatmul.msk.bf16.vlgmr.msrb.gmra.mxu1 %vm1381_vm3, %v3245_v40 }
 0x1df   :  { %1753 = vmatpush.bf16.msra.mxu2 %v3556_v6  ;;  %1766 = vmatpush.bf16.msrb.mxu3 %v3558_v7 }
 0x1e0   :  { %1789 = vmatpush.bf16.msra.mxu0 %v3556_v6  ;;  %1802 = vmatpush.bf16.msrb.mxu1 %v3558_v7  ;;  %v3791_v20 = vpop.f32.mrf.mxu2  ;;  %v3793_v57 = vpop.f32.mrf.mxu3 }
 0x1e1   :  { %v1104_v46 = vmax.f32 %v1074_v33, %v3791_v20  ;;  %v1105_v49 = vmax.f32 %v1075_v19, %v3793_v57  ;;  %v2918_v20 = vld [vmem:[#allocation2 + $0x70] sm:$0xff] }
 0x1e3   :  { %v1119_v58 = vpop.f32.mrf.mxu0  ;;  %v1132_v21 = vpop.f32.mrf.mxu1  ;;  %1754 = vmatpush.bf16.msra.mxu2 %v3582_v0  ;;  %1767 = vmatpush.bf16.msrb.mxu3 %v3584_v36  ;;  %v1135_v61 = vmax.f32 %v1105_v49, %v3774_v18  ;;  %v2907_v49 = vld [vmem:[#allocation2 + $0x18] sm:$0xff] }
 0x1e4   :  { %1790 = vmatpush.bf16.msra.mxu0 %v3582_v0  ;;  %1803 = vmatpush.bf16.msrb.mxu1 %v3584_v36 }
 0x1e7   :  { %1755 = vmatpush.bf16.msra.mxu2 %v3600_v50  ;;  %1768 = vmatpush.bf16.msrb.mxu3 %v3608_v55 }
 0x1e8   :  { %1791 = vmatpush.bf16.msra.mxu0 %v3600_v50  ;;  %1804 = vmatpush.bf16.msrb.mxu1 %v3608_v55  ;;  %v1089_v40 = vpop.f32.mrf.mxu2  ;;  %v1102_v63 = vpop.f32.mrf.mxu3 }
 0x1eb   :  { %v3805_v1 = vpop.f32.mrf.mxu0  ;;  %v3807_v22 = vpop.f32.mrf.mxu1  ;;  %1756 = vmatpush.bf16.msra.mxu2 %v3626_v2  ;;  %1769 = vmatpush.bf16.msrb.mxu3 %v3628_v3 }
 0x1ec   :  { %1792 = vmatpush.bf16.msra.mxu0 %v3626_v2  ;;  %1805 = vmatpush.bf16.msrb.mxu1 %v3628_v3 }
 0x1ed   :  { %2647 = vmatmul.msk.bf16.vlgmr.msrb.gmra.mxu2 %vm1381_vm3, %v3247_v41  ;;  %2648 = vmatmul.msk.bf16.vlgmr.msra.gmra.mxu3 %vm1381_vm3, %v3247_v41  ;;  %v1780_v41 = vpop.permute.xlu1 %1779 }
 0x1ee   :  { %2649 = vmatmul.msk.bf16.vlgmr.msrb.gmra.mxu0 %vm1381_vm3, %v3265_v44  ;;  %2650 = vmatmul.msk.bf16.vlgmr.msra.gmra.mxu1 %vm1381_vm3, %v3265_v44  ;;  %v1778_v44 = vpop.permute.xlu0 %1777 }
 0x1ef   :  { %1819 = vmatpush.bf16.msrb.mxu2 %v3556_v6  ;;  %1832 = vmatpush.bf16.msra.mxu3 %v3558_v7  ;;  %v1781_v31 = vsel %vm770_vm2, %v1778_v44, %v1780_v41 }
 0x1f0   :  { %1849 = vmatpush.bf16.msrb.mxu0 %v3556_v6  ;;  %1862 = vmatpush.bf16.msra.mxu1 %v3558_v7  ;;  %v1147_v24 = vpop.f32.mrf.mxu2  ;;  %v1160_v32 = vpop.f32.mrf.mxu3 }
 0x1f1   :  { %v1165_v10 = vmax.f32 %v1135_v61, %v1160_v32  ;;  %v2929_v32 = vld [vmem:[#allocation2 + $0xc8] sm:$0xff]  ;;  %v2906_v61 = vld [vmem:[#allocation2 + $0x10] sm:$0xff] }
 0x1f3   :  { %v1179_v25 = vpop.f32.mrf.mxu0  ;;  %v1192_v27 = vpop.f32.mrf.mxu1  ;;  %1820 = vmatpush.bf16.msrb.mxu2 %v3582_v0  ;;  %1833 = vmatpush.bf16.msra.mxu3 %v3584_v36  ;;  %v1195_v13 = vmax.f32 %v1165_v10, %v3807_v22 }
 0x1f4   :  { %1850 = vmatpush.bf16.msrb.mxu0 %v3582_v0  ;;  %1863 = vmatpush.bf16.msra.mxu1 %v3584_v36  ;;  %v2909_v25 = vld [vmem:[#allocation2 + $0x28] sm:$0xff] }
 0x1f5   :  { %v2917_v27 = vld [vmem:[#allocation2 + $0x68] sm:$0xff] }
 0x1f7   :  { %1821 = vmatpush.bf16.msrb.mxu2 %v3600_v50  ;;  %1834 = vmatpush.bf16.msra.mxu3 %v3608_v55 }
 0x1f8   :  { %1851 = vmatpush.bf16.msrb.mxu0 %v3600_v50  ;;  %1864 = vmatpush.bf16.msra.mxu1 %v3608_v55  ;;  %v1149_v28 = vpop.f32.mrf.mxu2  ;;  %v1162_v29 = vpop.f32.mrf.mxu3 }
 0x1f9   :  { %v2920_v28 = vld [vmem:[#allocation2 + $0x80] sm:$0xff] }
 0x1fa   :  { %v2928_v29 = vld [vmem:[#allocation2 + $0xc0] sm:$0xff] }
 0x1fb   :  { %v3841_v38 = vpop.f32.mrf.mxu0  ;;  %v3843_v42 = vpop.f32.mrf.mxu1  ;;  %1822 = vmatpush.bf16.msrb.mxu2 %v3626_v2  ;;  %1835 = vmatpush.bf16.msra.mxu3 %v3628_v3 }
 0x1fc   :  { %1852 = vmatpush.bf16.msrb.mxu0 %v3626_v2  ;;  %1865 = vmatpush.bf16.msra.mxu1 %v3628_v3 }
 0x1fd   :  { %2651 = vmatmul.msk.bf16.vlgmr.msra.gmra.mxu2 %vm1381_vm3, %v3271_v47  ;;  %2652 = vmatmul.msk.bf16.vlgmr.msrb.gmra.mxu3 %vm1381_vm3, %v3271_v47  ;;  %v1134_v47 = vmax.f32 %v1104_v46, %v3772_v17  ;;  %v2930_v17 = vld [vmem:[#allocation2 + $0xd0] sm:$0xff] }
 0x1fe   :  { %2653 = vmatmul.msk.bf16.vlgmr.msra.gmra.mxu0 %vm1381_vm3, %v1781_v31  ;;  %2654 = vmatmul.msk.bf16.vlgmr.msrb.gmra.mxu1 %vm1381_vm3, %v1781_v31  ;;  %v2908_v31 = vld [vmem:[#allocation2 + $0x20] sm:$0xff] }
 0x1ff   :  { %1879 = vmatpush.bf16.msra.mxu2 %v3556_v6  ;;  %1892 = vmatpush.bf16.msrb.mxu3 %v3558_v7  ;;  %v1164_v8 = vmax.f32 %v1134_v47, %v1147_v24  ;;  %v2924_v6 = vld [vmem:[#allocation2 + $0xa0] sm:$0xff]  ;;  %v2921_v24 = vld [vmem:[#allocation2 + $0x88] sm:$0xff] }
 0x200   :  { %2079 = vmatpush.bf16.msra.mxu0 %v2927_v43  ;;  %2092 = vmatpush.bf16.msrb.mxu1 %v2935_v45  ;;  %v1213_v59 = vpop.f32.mrf.mxu2  ;;  %v1226_v60 = vpop.f32.mrf.mxu3  ;;  %v2932_v7 = vld [vmem:[#allocation2 + $0xe0] sm:$0xff] }
 0x201   :  { %v1194_v35 = vmax.f32 %v1164_v8, %v3805_v1  ;;  %v2916_v43 = vld [vmem:[#allocation2 + $0x60] sm:$0xff] }
 0x203   :  { %v1245_v62 = vpop.f32.mrf.mxu0  ;;  %v1258_v4 = vpop.f32.mrf.mxu1  ;;  %1880 = vmatpush.bf16.msra.mxu2 %v3582_v0  ;;  %1893 = vmatpush.bf16.msrb.mxu3 %v3584_v36  ;;  %v1230_v14 = vmax.f32 %v1194_v35, %v1213_v59  ;;  %v1231_v0 = vmax.f32 %v1195_v13, %v1226_v60  ;;  %v724_v59 = vld [vmem:[%s3953_s4] sm:$0x3] }
 0x204   :  { %2080 = vmatpush.bf16.msra.mxu0 %v2926_v53  ;;  %2093 = vmatpush.bf16.msrb.mxu1 %v2934_v54  ;;  %v2915_v53 = vld [vmem:[#allocation2 + $0x58] sm:$0xff]  ;;  %v2973_v54 = vld [vmem:[%s3949_s0 + $0x8] sm:$0xf]  ;;  %v2914_v62 = vld [vmem:[#allocation2 + $0x50] sm:$0xff]  ;;  %v726_v4 = vperm.slane %v724_v59, 0 }
 0x207   :  { %1881 = vmatpush.bf16.msra.mxu2 %v3600_v50  ;;  %1894 = vmatpush.bf16.msrb.mxu3 %v3608_v55  ;;  %v2919_v50 = vld [vmem:[#allocation2 + $0x78] sm:$0xff]  ;;  %v2594_v55 = vld [vmem:[%s3953_s4 + $0x2] sm:$0x3] }
 0x208   :  { %2081 = vmatpush.bf16.msra.mxu0 %v2925_v5  ;;  %2094 = vmatpush.bf16.msrb.mxu1 %v2933_v34  ;;  %v1215_v11 = vpop.f32.mrf.mxu2  ;;  %v1228_v12 = vpop.f32.mrf.mxu3  ;;  %v1326_v21 = vperm.slane %v2594_v55, 1  ;;  %v727_v5 = vperm.slane %v724_v59, 1 }
 0x209   :  { %v2913_v11 = vld [vmem:[#allocation2 + $0x48] sm:$0xff]  ;;  %v730_v12 = vadd.f32 %v726_v4, %v3602_v51 }
 0x20a   :  { %v731_v35 = vadd.f32 %v727_v5, %v3604_v52 }
 0x20b   :  { %v1303_v26 = vpop.f32.mrf.mxu0  ;;  %v1316_v36 = vpop.f32.mrf.mxu1  ;;  %1882 = vmatpush.bf16.msra.mxu2 %v3626_v2  ;;  %1895 = vmatpush.bf16.msrb.mxu3 %v3628_v3  ;;  %v1260_v2 = vmax.f32 %v1230_v14, %v3841_v38  ;;  %v1261_v3 = vmax.f32 %v1231_v0, %v3843_v42  ;;  %v2904_v0 = vld [vmem:[#allocation2] sm:$0xff] }
 0x20c   :  { %2082 = vmatpush.bf16.msra.mxu0 %v2924_v6  ;;  %2095 = vmatpush.bf16.msrb.mxu1 %v2932_v7  ;;  %v2905_v7 = vld [vmem:[#allocation2 + $0x8] sm:$0xff] }
 0x20d   :  { %2655 = vmatmul.msk.bf16.vlgmr.msrb.gmra.mxu2 %vm1381_vm3, %v3554_v23  ;;  %2656 = vmatmul.msk.bf16.vlgmr.msra.gmra.mxu3 %vm1381_vm3, %v3554_v23 }
 0x20e   :  { %2657 = vmatmul.msk.bf16.vlgmr.msrb.gmra.mxu0 %vm1381_vm3, %v3318_v56  ;;  %2658 = vmatmul.msk.bf16.vlgmr.msra.gmra.mxu1 %vm1381_vm3, %v3318_v56  ;;  %v1325_v56 = vperm.slane %v2594_v55, 0 }
 0x20f   :  { %2201 = vmatpush.bf16.msrb.mxu2 %v2911_v39  ;;  %2214 = vmatpush.bf16.msra.mxu3 %v2919_v50 }
 0x210   :  { %2083 = vmatpush.bf16.msra.mxu0 %v2923_v9  ;;  %2096 = vmatpush.bf16.msrb.mxu1 %v2931_v16  ;;  %v1273_v23 = vpop.f32.mrf.mxu2  ;;  %v1286_v18 = vpop.f32.mrf.mxu3  ;;  %v733_v9 = vmax.f32 %v731_v35, 0.0 }
 0x211   :  { %v1290_v57 = vmax.f32 %v1260_v2, %v1273_v23  ;;  %v1291_v58 = vmax.f32 %v1261_v3, %v1286_v18 }
 0x212   :  { %v1915_v55 = vpack.c.bf16 %v733_v9, %v733_v9  ;;  %v2947_v9 = vld [vmem:[#allocation2 + $0x158] sm:$0xff] }
 0x213   :  { %v1320_v40 = vmax.f32 %v1290_v57, %v1303_v26  ;;  %v1321_v63 = vmax.f32 %v1291_v58, %v1316_v36  ;;  %v1305_v1 = vpop.f32.mrf.mxu0  ;;  %v1318_v22 = vpop.f32.mrf.mxu1  ;;  %2202 = vmatpush.bf16.msrb.mxu2 %v2910_v48  ;;  %2215 = vmatpush.bf16.msra.mxu3 %v2918_v20  ;;  %v2912_v26 = vld [vmem:[#allocation2 + $0x40] sm:$0xff]  ;;  %v732_v36 = vmax.f32 %v730_v12, 0.0 }
 0x214   :  { %2084 = vmatpush.bf16.msra.mxu0 %v2922_v15  ;;  %2097 = vmatpush.bf16.msrb.mxu1 %v2930_v17 }
 0x215   :  { %v1329_v41 = vadd.f32 %v1325_v56, %v1320_v40  ;;  %v1330_v44 = vadd.f32 %v1326_v21, %v1321_v63  ;;  %v1914_v50 = vpack.c.bf16 %v732_v36, %v732_v36  ;;  %v2939_v36 = vld [vmem:[#allocation2 + $0x118] sm:$0xff] }
 0x217   :  { %v1331_v30 = vmax.f32 %v1329_v41, 0.0  ;;  %v1332_v37 = vmax.f32 %v1330_v44, 0.0  ;;  %2203 = vmatpush.bf16.msrb.mxu2 %v2909_v25  ;;  %2216 = vmatpush.bf16.msra.mxu3 %v2917_v27 }
 0x218   :  { %2085 = vmatpush.bf16.msra.mxu0 %v2921_v24  ;;  %2098 = vmatpush.bf16.msrb.mxu1 %v2929_v32  ;;  %v1275_v38 = vpop.f32.mrf.mxu2  ;;  %v1288_v42 = vpop.f32.mrf.mxu3 }
 0x219   :  { %v1948_v19 = vpack.c.bf16 %v1331_v30, %v1331_v30  ;;  %v1949_v46 = vpack.c.bf16 %v1332_v37, %v1332_v37 }
 0x21b   :  { %v1421_v45 = vpop.f32.mrf.mxu0  ;;  %v1434_v33 = vpop.f32.mrf.mxu1  ;;  %2204 = vmatpush.bf16.msrb.mxu2 %v2908_v31  ;;  %2217 = vmatpush.bf16.msra.mxu3 %v2916_v43 }
 0x21c   :  { %2086 = vmatpush.bf16.msra.mxu0 %v2920_v28  ;;  %2099 = vmatpush.bf16.msrb.mxu1 %v2928_v29 }
 0x21d   :  { %2659 = vmatmul.msk.bf16.vlgmr.msra.gmra.mxu2 %vm1381_vm3, %v2973_v54  ;;  %2660 = vmatmul.msk.bf16.vlgmr.msrb.gmra.mxu3 %vm1381_vm3, %v2973_v54 }
 0x21f   :  { %2087 = vmatmul.bf16.vlgmr.msra.gmra.mxu0 %v1948_v19  ;;  %2100 = vmatmul.bf16.vlgmr.msrb.gmra.mxu1 %v1949_v46 }
 0x220   :  { %2205 = vmatpush.bf16.msrb.mxu2 %v2907_v49  ;;  %2218 = vmatpush.bf16.msra.mxu3 %v2915_v53  ;;  %v1393_v60 = vpop.f32.mrf.mxu2  ;;  %v1406_v47 = vpop.f32.mrf.mxu3 }
 0x221   :  { %v1438_v34 = vmax.f32 %v1393_v60, %v1421_v45  ;;  %v1439_v8 = vmax.f32 %v1406_v47, %v1434_v33 }
 0x223   :  { %v1423_v10 = vpop.f32.mrf.mxu0  ;;  %v1436_v6 = vpop.f32.mrf.mxu1 }
 0x224   :  { %2206 = vmatpush.bf16.msrb.mxu2 %v2906_v61  ;;  %2219 = vmatpush.bf16.msra.mxu3 %v2914_v62  ;;  %v2943_v61 = vld [vmem:[#allocation2 + $0x138] sm:$0xff] }
 0x225   :  { %v2951_v62 = vld [vmem:[#allocation2 + $0x178] sm:$0xff]  ;;  %2358 = vmatpush.bf16.msrb.mxu0 %v2943_v61 }
 0x226   :  { %2371 = vmatpush.bf16.msra.mxu1 %v2951_v62 }
 0x228   :  { %2207 = vmatpush.bf16.msrb.mxu2 %v2905_v7  ;;  %2220 = vmatpush.bf16.msra.mxu3 %v2913_v11  ;;  %v1395_v13 = vpop.f32.mrf.mxu2  ;;  %v1408_v14 = vpop.f32.mrf.mxu3  ;;  %v2941_v7 = vld [vmem:[#allocation2 + $0x128] sm:$0xff] }
 0x229   :  { %v2949_v11 = vld [vmem:[#allocation2 + $0x168] sm:$0xff]  ;;  %v2940_v13 = vld [vmem:[#allocation2 + $0x120] sm:$0xff] }
 0x22a   :  { %v2948_v14 = vld [vmem:[#allocation2 + $0x160] sm:$0xff] }
 0x22b   :  { %v1481_v16 = vpop.f32.mrf.mxu0  ;;  %v1494_v39 = vpop.f32.mrf.mxu1 }
 0x22c   :  { %2208 = vmatpush.bf16.msrb.mxu2 %v2904_v0  ;;  %2221 = vmatpush.bf16.msra.mxu3 %v2912_v26 }
 0x22f   :  { %2209 = vmatmul.bf16.vlgmr.msrb.gmra.mxu2 %v1914_v50  ;;  %2222 = vmatmul.bf16.vlgmr.msra.gmra.mxu3 %v1915_v55  ;;  %v2938_v50 = vld [vmem:[#allocation2 + $0x110] sm:$0xff] }
 0x230   :  { %v1451_v2 = vpop.f32.mrf.mxu2  ;;  %v1464_v51 = vpop.f32.mrf.mxu3  ;;  %v2946_v55 = vld [vmem:[#allocation2 + $0x150] sm:$0xff] }
 0x231   :  { %v1468_v3 = vmax.f32 %v1438_v34, %v1451_v2  ;;  %v1469_v52 = vmax.f32 %v1439_v8, %v1464_v51  ;;  %v2942_v34 = vld [vmem:[#allocation2 + $0x130] sm:$0xff] }
 0x232   :  { %v2950_v8 = vld [vmem:[#allocation2 + $0x170] sm:$0xff]  ;;  %2359 = vmatpush.bf16.msrb.mxu0 %v2942_v34 }
 0x233   :  { %v1483_v15 = vpop.f32.mrf.mxu0  ;;  %v1496_v17 = vpop.f32.mrf.mxu1  ;;  %v1498_v23 = vmax.f32 %v1468_v3, %v1481_v16  ;;  %v1499_v18 = vmax.f32 %v1469_v52, %v1494_v39  ;;  %2372 = vmatpush.bf16.msra.mxu1 %v2950_v8  ;;  %v2937_v3 = vld [vmem:[#allocation2 + $0x108] sm:$0xff] }
 0x234   :  { %v2945_v52 = vld [vmem:[#allocation2 + $0x148] sm:$0xff] }
 0x236   :  { %2360 = vmatpush.bf16.msrb.mxu0 %v2941_v7 }
 0x237   :  { %2373 = vmatpush.bf16.msra.mxu1 %v2949_v11  ;;  %v2956_v11 = vld [vmem:[%s3956_s7 + $0x20] sm:$0xff] }
 0x238   :  { %v1453_v48 = vpop.f32.mrf.mxu2  ;;  %v1466_v20 = vpop.f32.mrf.mxu3 }
 0x23a   :  { %2361 = vmatpush.bf16.msrb.mxu0 %v2940_v13 }
 0x23b   :  { %v1548_v57 = vpop.f32.mrf.mxu0  ;;  %v1561_v56 = vpop.f32.mrf.mxu1  ;;  %2374 = vmatpush.bf16.msra.mxu1 %v2948_v14 }
 0x23e   :  { %2362 = vmatpush.bf16.msrb.mxu0 %v2939_v36  ;;  %v2955_v36 = vld [vmem:[%s3956_s7 + $0x18] sm:$0xff] }
 0x23f   :  { %2375 = vmatpush.bf16.msra.mxu1 %v2947_v9 }
 0x240   :  { %v1511_v58 = vpop.f32.mrf.mxu2  ;;  %v1524_v21 = vpop.f32.mrf.mxu3 }
 0x241   :  { %v1528_v40 = vmax.f32 %v1498_v23, %v1511_v58  ;;  %v1529_v63 = vmax.f32 %v1499_v18, %v1524_v21  ;;  %v2936_v23 = vld [vmem:[#allocation2 + $0x100] sm:$0xff] }
 0x242   :  { %2363 = vmatpush.bf16.msrb.mxu0 %v2938_v50  ;;  %v2944_v18 = vld [vmem:[#allocation2 + $0x140] sm:$0xff] }
 0x243   :  { %v1550_v1 = vpop.f32.mrf.mxu0  ;;  %v1563_v22 = vpop.f32.mrf.mxu1  ;;  %v1565_v24 = vmax.f32 %v1528_v40, %v1548_v57  ;;  %v1566_v32 = vmax.f32 %v1529_v63, %v1561_v56  ;;  %2376 = vmatpush.bf16.msra.mxu1 %v2946_v55 }
 0x246   :  { %2364 = vmatpush.bf16.msrb.mxu0 %v2937_v3  ;;  %v2953_v3 = vld [vmem:[%s3956_s7 + $0x8] sm:$0xff] }
 0x247   :  { %2377 = vmatpush.bf16.msra.mxu1 %v2945_v52  ;;  %v2952_v52 = vld [vmem:[%s3956_s7] sm:$0xff] }
 0x248   :  { %v1513_v25 = vpop.f32.mrf.mxu2  ;;  %v1526_v27 = vpop.f32.mrf.mxu3 }
 0x24a   :  { %2365 = vmatpush.bf16.msrb.mxu0 %v2936_v23 }
 0x24b   :  { %v3895_v41 = vpop.f32.mrf.mxu0  ;;  %v3897_v44 = vpop.f32.mrf.mxu1  ;;  %2378 = vmatpush.bf16.msra.mxu1 %v2944_v18  ;;  %v2969_v18 = vld [vmem:[%s3955_s6] ss:$0 sm:$0xff] }
 0x250   :  { %v1578_v28 = vpop.f32.mrf.mxu2  ;;  %v1591_v29 = vpop.f32.mrf.mxu3 }
 0x251   :  { %v3899_v30 = vmax.f32 %v1565_v24, %v1578_v28  ;;  %v3901_v37 = vmax.f32 %v1566_v32, %v1591_v29 }
 0x253   :  { %v1610_v38 = vpop.f32.mrf.mxu0  ;;  %v1623_v42 = vpop.f32.mrf.mxu1  ;;  %v1625_v31 = vmax.f32 %v3899_v30, %v3895_v41  ;;  %v1626_v43 = vmax.f32 %v3901_v37, %v3897_v44 }
 0x258   :  { %v1580_v45 = vpop.f32.mrf.mxu2  ;;  %v1593_v33 = vpop.f32.mrf.mxu3 }
 0x25b   :  { %v3907_v19 = vpop.f32.mrf.mxu0  ;;  %v3909_v46 = vpop.f32.mrf.mxu1 }
 0x260   :  { %v1638_v49 = vpop.f32.mrf.mxu2  ;;  %v1651_v53 = vpop.f32.mrf.mxu3 }
 0x261   :  { %v1655_v57 = vmax.f32 %v1625_v31, %v1638_v49  ;;  %v1656_v56 = vmax.f32 %v1626_v43, %v1651_v53  ;;  %v2959_v31 = vld [vmem:[%s3956_s7 + $0x38] sm:$0xff]  ;;  %v2661_v49 = vld [vmem:[%s3953_s4 + $0x4] sm:$0x3]  ;;  %v2958_v53 = vld [vmem:[%s3956_s7 + $0x30] sm:$0xff] }
 0x262   :  { %2460 = vmatpush.bf16.msra.mxu2 %v2959_v31 }
 0x263   :  { %v1670_v54 = vpop.f32.mrf.mxu0  ;;  %v1683_v59 = vpop.f32.mrf.mxu1  ;;  %v1685_v40 = vmax.f32 %v1655_v57, %v3907_v19  ;;  %v1686_v63 = vmax.f32 %v1656_v56, %v3909_v46 }
 0x264   :  { %v1906_v59 = vperm.slane %v2661_v49, 0 }
 0x266   :  { %2461 = vmatpush.bf16.msra.mxu2 %v2958_v53 }
 0x268   :  { %v1640_v60 = vpop.f32.mrf.mxu2  ;;  %v1653_v47 = vpop.f32.mrf.mxu3 }
 0x269   :  { %v1907_v47 = vperm.slane %v2661_v49, 1 }
 0x26b   :  { %v1728_v4 = vpop.f32.mrf.mxu0  ;;  %v1741_v5 = vpop.f32.mrf.mxu1 }
 0x270   :  { %v1698_v10 = vpop.f32.mrf.mxu2  ;;  %v1711_v6 = vpop.f32.mrf.mxu3 }
 0x271   :  { %v1715_v1 = vmax.f32 %v1685_v40, %v1698_v10  ;;  %v1716_v22 = vmax.f32 %v1686_v63, %v1711_v6  ;;  %v2970_v40 = vld [vmem:[%s3957_s8] ss:$0 sm:$0xff] }
 0x273   :  { %v1730_v12 = vpop.f32.mrf.mxu0  ;;  %v1743_v35 = vpop.f32.mrf.mxu1  ;;  %v1745_v25 = vmax.f32 %v1715_v1, %v1728_v4  ;;  %v1746_v27 = vmax.f32 %v1716_v22, %v1741_v5  ;;  %v2957_v4 = vld [vmem:[%s3956_s7 + $0x28] sm:$0xff] }
 0x274   :  { %2462 = vmatpush.bf16.msra.mxu2 %v2957_v4 }
 0x278   :  { %v1700_v0 = vpop.f32.mrf.mxu2  ;;  %v1713_v26 = vpop.f32.mrf.mxu3  ;;  %2463 = vmatpush.bf16.msra.mxu2 %v2956_v11 }
 0x27b   :  { %v1794_v16 = vpop.f32.mrf.mxu0  ;;  %v1807_v39 = vpop.f32.mrf.mxu1 }
 0x27c   :  { %2464 = vmatpush.bf16.msra.mxu2 %v2955_v36 }
 0x280   :  { %v1758_v2 = vpop.f32.mrf.mxu2  ;;  %v1771_v51 = vpop.f32.mrf.mxu3 }
 0x281   :  { %v1775_v28 = vmax.f32 %v1745_v25, %v1758_v2  ;;  %v1776_v29 = vmax.f32 %v1746_v27, %v1771_v51  ;;  %v2954_v51 = vld [vmem:[%s3956_s7 + $0x10] sm:$0xff] }
 0x282   :  { %2465 = vmatpush.bf16.msra.mxu2 %v2954_v51 }
 0x283   :  { %v1796_v15 = vpop.f32.mrf.mxu0  ;;  %v1809_v17 = vpop.f32.mrf.mxu1  ;;  %v1811_v38 = vmax.f32 %v1775_v28, %v1794_v16  ;;  %v1812_v42 = vmax.f32 %v1776_v29, %v1807_v39 }
 0x286   :  { %2466 = vmatpush.bf16.msra.mxu2 %v2953_v3 }
 0x288   :  { %v1760_v48 = vpop.f32.mrf.mxu2  ;;  %v1773_v20 = vpop.f32.mrf.mxu3 }
 0x28a   :  { %2467 = vmatpush.bf16.msra.mxu2 %v2952_v52 }
 0x28b   :  { %v1854_v58 = vpop.f32.mrf.mxu0  ;;  %v1867_v21 = vpop.f32.mrf.mxu1 }
 0x290   :  { %v1824_v24 = vpop.f32.mrf.mxu2  ;;  %v1837_v32 = vpop.f32.mrf.mxu3 }
 0x291   :  { %v1841_v43 = vmax.f32 %v1811_v38, %v1824_v24  ;;  %v1842_v45 = vmax.f32 %v1812_v42, %v1837_v32 }
 0x293   :  { %v1856_v41 = vpop.f32.mrf.mxu0  ;;  %v1869_v44 = vpop.f32.mrf.mxu1  ;;  %v1871_v54 = vmax.f32 %v1841_v43, %v1854_v58  ;;  %v1872_v60 = vmax.f32 %v1842_v45, %v1867_v21 }
 0x298   :  { %v1826_v30 = vpop.f32.mrf.mxu2  ;;  %v1839_v37 = vpop.f32.mrf.mxu3 }
 0x29c   :  { %v2088_v33 = vpop.f32.mrf.mxu0  ;;  %v2101_v19 = vpop.f32.mrf.mxu1 }
 0x29d   :  { %v2102_v46 = vadd.f32 %v2101_v19, %v2088_v33 }
 0x2a0   :  { %v1884_v61 = vpop.f32.mrf.mxu2  ;;  %v1897_v62 = vpop.f32.mrf.mxu3 }
 0x2a1   :  { %v1901_v5 = vmax.f32 %v1871_v54, %v1884_v61  ;;  %v1902_v34 = vmax.f32 %v1872_v60, %v1897_v62 }
 0x2a3   :  { %v1910_v8 = vadd.f32 %v1906_v59, %v1901_v5  ;;  %v1911_v10 = vadd.f32 %v1907_v47, %v1902_v34 }
 0x2a4   :  { %v2090_v6 = vpop.f32.mrf.mxu0  ;;  %v2103_v7 = vpop.f32.mrf.mxu1 }
 0x2a5   :  { %v1912_v12 = vmax.f32 %v1910_v8, 0.0  ;;  %v1913_v35 = vmax.f32 %v1911_v10, 0.0 }
 0x2a7   :  { %v2227_v13 = vpack.c.bf16 %v1912_v12, %v1912_v12  ;;  %v2228_v14 = vpack.c.bf16 %v1913_v35, %v1913_v35 }
 0x2a8   :  { %v1886_v0 = vpop.f32.mrf.mxu2  ;;  %v1899_v26 = vpop.f32.mrf.mxu3 }
 0x2a9   :  { %2366 = vmatmul.bf16.vlgmr.msrb.gmra.mxu0 %v2227_v13  ;;  %2379 = vmatmul.bf16.vlgmr.msra.gmra.mxu1 %v2228_v14 }
 0x2b2   :  { %v2210_v9 = vpop.f32.mrf.mxu2  ;;  %v2223_v16 = vpop.f32.mrf.mxu3 }
 0x2b3   :  { %v2211_v39 = vadd.f32 %v2210_v9, %v2102_v46 }
 0x2b5   :  { %v2224_v50 = vadd.f32 %v2223_v16, %v2211_v39 }
 0x2ba   :  { %v2212_v55 = vpop.f32.mrf.mxu2  ;;  %v2225_v2 = vpop.f32.mrf.mxu3 }
 0x326   :  { %v2367_v15 = vpop.f32.mrf.mxu0  ;;  %v2380_v17 = vpop.f32.mrf.mxu1 }
 0x327   :  { %v2381_v23 = vadd.f32 %v2380_v17, %v2367_v15 }
 0x329   :  { %v2384_v48 = vadd.f32 %v2381_v23, %v2224_v50 }
 0x32b   :  { %v2389_v20 = vadd.f32 %v2969_v18, %v2384_v48 }
 0x32d   :  { %v2390_v57 = vmax.f32 %v2389_v20, 0.0 }
 0x32e   :  { %v2369_v56 = vpop.f32.mrf.mxu0  ;;  %v2382_v58 = vpop.f32.mrf.mxu1 }
 0x32f   :  { %v2391_v21 = vpack.c.bf16 %v2390_v57, %v2390_v57 }
 0x331   :  { %2468 = vmatmul.bf16.vlgmr.msra.gmra.mxu2 %v2391_v21 }
 0x3b4   :  { %v2469_v63 = vpop.f32.mrf.mxu2 }
 0x3b5   :  { %v2470_v1 = vadd.f32 %v2970_v40, %v2469_v63 }
 0x3b7   :  { %2474 = vst.msk [vmem:[%s3958_s9] sm:$0xff] %vm2473_vm4, %v2470_v1 }
 0x3bc   :  { %v2471_v22 = vpop.f32.mrf.mxu2 }
 0x3bd   :  { %2479 = vsyncpa [#allocation3], 1 }

</bundles_post_ra>
